<compile_context>
chip_gen: v7x
topology: tpu7x:2x2x1
jax: 0.10.0
libtpu: 0.0.40
codegen_flags: <defaults>
</compile_context>

<pallas_src>
import functools
import math

import jax
import jax.numpy as jnp
from jax import lax
from jax.experimental import pallas as pl
from jax.experimental.pallas import tpu as pltpu


def _round_up(x, m):
    return (x + m - 1) // m * m


def _flash_attn_kernel(nkb_ref, vl_ref, q_ref, k_ref, v_ref, o_ref,
                       m_sc, l_sc, acc_sc, q_sc, *,
                       scale, block_k, k_orig,
                       apply_vl_mask, apply_pad_mask, compute_dtype):
    b = pl.program_id(0)
    ki = pl.program_id(2)
    nk = pl.num_programs(2)

    @pl.when(ki == 0)
    def _init():
        m_sc[...] = jnp.full_like(m_sc, -jnp.inf)
        l_sc[...] = jnp.zeros_like(l_sc)
        acc_sc[...] = jnp.zeros_like(acc_sc)
        # Hoisted per-(b, qi) work: fold 1/sqrt(d) into q and cast to the MXU
        # compute dtype once, instead of once per K step.
        q_sc[...] = (q_ref[0] * scale).astype(compute_dtype)

    # Skip K tiles that are entirely masked out for this batch element
    # (their DMA is also elided by the clamped k/v index_map).
    @pl.when(ki < nkb_ref[b])
    def _tile():
        q = q_sc[...]                          # (tq, D), pre-scaled + cast
        k = k_ref[0].astype(compute_dtype)     # (tk, D)
        v = v_ref[0].astype(compute_dtype)     # (tk, V)

        # scores = q @ k^T, contraction on D without an explicit transpose.
        s = lax.dot_general(q, k, (((1,), (1,)), ((), ())),
                            preferred_element_type=jnp.float32)   # (tq, tk)

        if apply_vl_mask or apply_pad_mask:
            col = lax.broadcasted_iota(jnp.int32, s.shape, 1) + ki * block_k
        if apply_vl_mask and apply_pad_mask:
            # One select per step: real-but-invalid columns get the reference's
            # -1e6; columns that only exist because K was padded get -inf.
            fill = jnp.where(col < k_orig, jnp.float32(-1e6),
                             jnp.float32(-jnp.inf))
            s = jnp.where(col < vl_ref[0], s, fill)
        elif apply_vl_mask:
            s = jnp.where(col < vl_ref[0], s, jnp.float32(-1e6))
        elif apply_pad_mask:
            s = jnp.where(col < k_orig, s, jnp.float32(-jnp.inf))

        # Online softmax update.
        m_prev = m_sc[...]
        m_new = jnp.maximum(m_prev, jnp.max(s, axis=-1, keepdims=True))
        alpha = jnp.exp(m_prev - m_new)
        p = jnp.exp(s - m_new)
        l_sc[...] = alpha * l_sc[...] + jnp.sum(p, axis=-1, keepdims=True)
        acc_sc[...] = alpha * acc_sc[...] + lax.dot_general(
            p.astype(compute_dtype), v, (((1,), (0,)), ((), ())),
            preferred_element_type=jnp.float32)
        m_sc[...] = m_new

    @pl.when(ki == nk - 1)
    def _finalize():
        # Exact normalization (cheap: one divide per query row).
        inv_l = 1.0 / l_sc[...]
        o_ref[0] = (acc_sc[...] * inv_l).astype(o_ref.dtype)


@functools.partial(jax.jit,
                   static_argnames=("block_q", "block_k", "compute_dtype"))
def dot_product_attention(queries, keys, values, valid_lens=None, *,
                          block_q=256, block_k=256,
                          compute_dtype=jnp.bfloat16):
    """queries (B,Q,D), keys (B,K,D), values (B,K,V); valid_lens None, (B,) or (B,Q).

    Returns the attention output (B, Q, V). compute_dtype controls the MXU
    operand dtype (accumulation is always f32); None keeps operands in the
    input dtype."""
    B, Q, D = queries.shape
    _, K, _ = keys.shape
    V = values.shape[-1]

    cdtype = jnp.dtype(compute_dtype) if compute_dtype is not None \
        else jnp.dtype(queries.dtype)

    # Normalize valid_lens to a per-query (B, Q) int32 array (matches the
    # repeat_interleave / reshape handling of the PyTorch masked_softmax).
    if valid_lens is None:
        vl2d = jnp.full((B, Q), K, dtype=jnp.int32)
    else:
        valid_lens = valid_lens.astype(jnp.int32)
        if valid_lens.ndim == 1:
            vl2d = jnp.broadcast_to(valid_lens[:, None], (B, Q))
        else:
            vl2d = valid_lens.reshape(B, Q)

    # Tile Q and K only; feature dims D / V stay unpadded (full-extent blocks).
    tq = min(block_q, _round_up(Q, 128))
    tk = min(block_k, _round_up(K, 128))
    Qp, Kp = _round_up(Q, tq), _round_up(K, tk)

    q_p = jnp.pad(queries, ((0, 0), (0, Qp - Q), (0, 0)))
    k_p = jnp.pad(keys, ((0, 0), (0, Kp - K), (0, 0)))
    v_p = jnp.pad(values, ((0, 0), (0, Kp - K), (0, 0)))
    vl_p = jnp.pad(vl2d, ((0, 0), (0, Qp - Q)))[..., None]     # (B, Qp, 1)

    nq, nk = Qp // tq, Kp // tk

    # Number of K tiles that contain any non-masked column, per batch element.
    # If any row in a batch has valid_len == 0, the reference normalizes that
    # row uniformly over ALL K columns, so we must process every tile.
    max_vl = jnp.max(vl2d, axis=1)
    min_vl = jnp.min(vl2d, axis=1)
    nkb = (max_vl + tk - 1) // tk
    nkb = jnp.where(min_vl > 0, nkb, nk)
    nkb = jnp.clip(nkb, 1, nk).astype(jnp.int32)

    kernel = functools.partial(
        _flash_attn_kernel,
        scale=1.0 / math.sqrt(D),
        block_k=tk,
        k_orig=K,
        apply_vl_mask=valid_lens is not None,
        apply_pad_mask=Kp != K,
        compute_dtype=cdtype,
    )

    grid_spec = pltpu.PrefetchScalarGridSpec(
        num_scalar_prefetch=1,              # nkb -> SMEM
        grid=(B, nq, nk),
        in_specs=[
            pl.BlockSpec((1, tq, 1), lambda b, qi, ki, nkb_s: (b, qi, 0)),
            pl.BlockSpec((1, tq, D), lambda b, qi, ki, nkb_s: (b, qi, 0)),
            pl.BlockSpec((1, tk, D),
                         lambda b, qi, ki, nkb_s: (b, jnp.minimum(ki, nkb_s[b] - 1), 0)),
            pl.BlockSpec((1, tk, V),
                         lambda b, qi, ki, nkb_s: (b, jnp.minimum(ki, nkb_s[b] - 1), 0)),
        ],
        out_specs=pl.BlockSpec((1, tq, V), lambda b, qi, ki, nkb_s: (b, qi, 0)),
        scratch_shapes=[
            pltpu.VMEM((tq, 1), jnp.float32),    # running max  m
            pltpu.VMEM((tq, 1), jnp.float32),    # running sum  l
            pltpu.VMEM((tq, V), jnp.float32),    # output accumulator
            pltpu.VMEM((tq, D), cdtype),         # pre-scaled / cast q
        ],
    )

    # VMEM budget from actual buffer arithmetic (double-buffered ins/outs
    # plus scratch), capped well below the v7x 64 MiB physical VMEM.
    isz = jnp.dtype(queries.dtype).itemsize
    buf_bytes = 2 * (tq * 4            # vl tile (int32)
                     + tq * D * isz    # q tile
                     + tk * D * jnp.dtype(keys.dtype).itemsize
                     + tk * V * jnp.dtype(values.dtype).itemsize
                     + tq * V * isz)   # out tile
    scratch_bytes = 2 * tq * 4 + tq * V * 4 + tq * D * cdtype.itemsize
    vmem_limit = int(min(max(2 * (buf_bytes + scratch_bytes), 16 * 1024 * 1024),
                         48 * 1024 * 1024))

    out = pl.pallas_call(
        kernel,
        out_shape=jax.ShapeDtypeStruct((B, Qp, V), queries.dtype),
        grid_spec=grid_spec,
        compiler_params=pltpu.CompilerParams(
            dimension_semantics=("parallel", "parallel", "arbitrary"),
            vmem_limit_bytes=vmem_limit,
        ),
    )(nkb, vl_p, q_p, k_p, v_p)

    return out[:, :Q, :]


def _reference(queries, keys, values, valid_lens):
    d = queries.shape[-1]
    scores = jnp.einsum("bqd,bkd->bqk", queries, keys,
                        precision=lax.Precision.HIGHEST) / math.sqrt(d)
    if valid_lens is None:
        w = jax.nn.softmax(scores, axis=-1)
    else:
        if valid_lens.ndim == 1:
            vl = valid_lens[:, None, None]
        else:
            vl = valid_lens[:, :, None]
        col = jnp.arange(scores.shape[-1])[None, None, :]
        w = jax.nn.softmax(jnp.where(col < vl, scores, -1e6), axis=-1)
    return jnp.einsum("bqk,bkv->bqv", w, values, precision=lax.Precision.HIGHEST)


if __name__ == "__main__":
    key = jax.random.PRNGKey(0)
    kq, kk, kv, kl, kq2, kk2, kv2, kl2 = jax.random.split(key, 8)

    # --- small shapes (module scale) ---
    B, Q, K, D, V = 2, 8, 8, 32, 32
    queries = jax.random.normal(kq, (B, Q, D), dtype=jnp.float32)
    keys = jax.random.normal(kk, (B, K, D), dtype=jnp.float32)
    values = jax.random.normal(kv, (B, K, V), dtype=jnp.float32)

    # bf16 MXU operands (default) keep f32 accumulation; errors stay ~1%.
    tol_bf16 = dict(atol=3e-2, rtol=3e-2)
    tol_f32 = dict(atol=1e-3, rtol=1e-3)

    # 1) per-batch valid_lens (B,) — default (bf16 operands) path
    valid_lens = jnp.array([3, 6], dtype=jnp.int32)
    out = dot_product_attention(queries, keys, values, valid_lens)
    jax.block_until_ready(out)
    assert out.shape == (B, Q, V)
    assert jnp.allclose(out, _reference(queries, keys, values, valid_lens), **tol_bf16)

    # 1b) same, full-f32 operand path
    out_f32 = dot_product_attention(queries, keys, values, valid_lens,
                                    compute_dtype=None)
    jax.block_until_ready(out_f32)
    assert jnp.allclose(out_f32, _reference(queries, keys, values, valid_lens), **tol_f32)

    # 2) no masking (valid_lens is None)
    out_none = dot_product_attention(queries, keys, values, None)
    jax.block_until_ready(out_none)
    assert jnp.allclose(out_none, _reference(queries, keys, values, None), **tol_bf16)

    # 3) per-query valid_lens (B, Q), including a degenerate 0-length row
    valid_lens_2d = jax.random.randint(kl, (B, Q), 1, K + 1, dtype=jnp.int32)
    valid_lens_2d = valid_lens_2d.at[0, 0].set(0)
    out_2d = dot_product_attention(queries, keys, values, valid_lens_2d)
    jax.block_until_ready(out_2d)
    assert jnp.allclose(out_2d, _reference(queries, keys, values, valid_lens_2d), **tol_bf16)

    # 4) multi-tile path: nq=2, nk=2, K padding, per-batch K-tile early exit
    #    (batch 0) and a valid_len==0 row (batch 1, uniform over all K).
    B2, Q2, K2, D2, V2 = 2, 300, 384, 64, 64
    q2 = jax.random.normal(kq2, (B2, Q2, D2), dtype=jnp.float32)
    k2 = jax.random.normal(kk2, (B2, K2, D2), dtype=jnp.float32)
    v2 = jax.random.normal(kv2, (B2, K2, V2), dtype=jnp.float32)
    vl2 = jax.random.randint(kl2, (B2, Q2), 1, K2 + 1, dtype=jnp.int32)
    vl2 = vl2.at[0].set(jnp.clip(vl2[0], 1, 100))   # batch 0: only K tile 0 needed
    vl2 = vl2.at[1, 3].set(0)                       # degenerate row in batch 1
    out2 = dot_product_attention(q2, k2, v2, vl2)
    jax.block_until_ready(out2)
    assert out2.shape == (B2, Q2, V2)
    assert jnp.allclose(out2, _reference(q2, k2, v2, vl2), **tol_bf16)

    print("KERNEL_OK")
</pallas_src>

<mosaic_0001>
module attributes {stable_mosaic.version = 11 : i64} {
  func.func @_flash_attn_kernel(%arg0: i32, %arg1: i32, %arg2: i32, %arg3: memref<2xi32, #tpu.memory_space<smem>>, %arg4: memref<1x128x1xi32, #tpu.memory_space<vmem>>, %arg5: memref<1x128x32xf32, #tpu.memory_space<vmem>>, %arg6: memref<1x128x32xf32, #tpu.memory_space<vmem>>, %arg7: memref<1x128x32xf32, #tpu.memory_space<vmem>>, %arg8: memref<1x128x32xf32, #tpu.memory_space<vmem>>, %arg9: memref<128x1xf32, #tpu.memory_space<vmem>>, %arg10: memref<128x1xf32, #tpu.memory_space<vmem>>, %arg11: memref<128x32xf32, #tpu.memory_space<vmem>>, %arg12: memref<128x32xbf16, #tpu.memory_space<vmem>>) attributes {dimension_semantics = [#tpu.dimension_semantics<parallel>, #tpu.dimension_semantics<parallel>, #tpu.dimension_semantics<arbitrary>], iteration_bounds = array<i64: 2, 1, 1>, scalar_prefetch = 1 : i64, scratch_operands = 4 : i64, tpu.core_type = #tpu.core_type<tc>, window_params = [{transform_indices = @transform_0, window_bounds = array<i64: 1, 128, 1>}, {transform_indices = @transform_1, window_bounds = array<i64: 1, 128, 32>}, {transform_indices = @transform_2, window_bounds = array<i64: 1, 128, 32>}, {transform_indices = @transform_3, window_bounds = array<i64: 1, 128, 32>}, {transform_indices = @transform_4, window_bounds = array<i64: 1, 128, 32>}]} {
    %c0_i32 = arith.constant 0 : i32
    %0 = arith.cmpi eq, %arg2, %c0_i32 : i32
    %1 = arith.extui %0 : i1 to i32
    %c0_i32_0 = arith.constant 0 : i32
    %2 = arith.cmpi ne, %1, %c0_i32_0 : i32
    scf.if %2 {
      %cst = arith.constant 0xFF800000 : f32
      %11 = vector.broadcast %cst : f32 to vector<128x1xf32>
      %c0 = arith.constant 0 : index
      %c0_4 = arith.constant 0 : index
      %12 = vector.load %arg9[%c0, %c0_4] : memref<128x1xf32, #tpu.memory_space<vmem>>, vector<128x1xf32>
      tpu.vector_store %arg9[%c0, %c0_4], %11 {strides = array<i32>} : memref<128x1xf32, #tpu.memory_space<vmem>>, vector<128x1xf32>,
      %cst_5 = arith.constant 0.000000e+00 : f32
      %13 = vector.broadcast %cst_5 : f32 to vector<128x1xf32>
      %c0_6 = arith.constant 0 : index
      %c0_7 = arith.constant 0 : index
      %14 = vector.load %arg10[%c0_6, %c0_7] : memref<128x1xf32, #tpu.memory_space<vmem>>, vector<128x1xf32>
      tpu.vector_store %arg10[%c0_6, %c0_7], %13 {strides = array<i32>} : memref<128x1xf32, #tpu.memory_space<vmem>>, vector<128x1xf32>,
      %cst_8 = arith.constant 0.000000e+00 : f32
      %15 = vector.broadcast %cst_8 : f32 to vector<128x32xf32>
      %c0_9 = arith.constant 0 : index
      %c0_10 = arith.constant 0 : index
      %16 = vector.load %arg11[%c0_9, %c0_10] : memref<128x32xf32, #tpu.memory_space<vmem>>, vector<128x32xf32>
      tpu.vector_store %arg11[%c0_9, %c0_10], %15 {strides = array<i32>} : memref<128x32xf32, #tpu.memory_space<vmem>>, vector<128x32xf32>,
      %c0_11 = arith.constant 0 : index
      %c0_12 = arith.constant 0 : index
      %c0_13 = arith.constant 0 : index
      %17 = vector.load %arg5[%c0_11, %c0_12, %c0_13] : memref<1x128x32xf32, #tpu.memory_space<vmem>>, vector<1x128x32xf32>
      %18 = vector.shape_cast %17 : vector<1x128x32xf32> to vector<128x32xf32>
      %cst_14 = arith.constant 0.176776692 : f32
      %19 = vector.broadcast %cst_14 : f32 to vector<128x32xf32>
      %20 = arith.mulf %18, %19 : vector<128x32xf32>
      %21 = arith.truncf %20 : vector<128x32xf32> to vector<128x32xbf16>
      %c0_15 = arith.constant 0 : index
      %c0_16 = arith.constant 0 : index
      %22 = vector.load %arg12[%c0_15, %c0_16] : memref<128x32xbf16, #tpu.memory_space<vmem>>, vector<128x32xbf16>
      tpu.vector_store %arg12[%c0_15, %c0_16], %21 {strides = array<i32>} : memref<128x32xbf16, #tpu.memory_space<vmem>>, vector<128x32xbf16>,
    } else {
    }
    %3 = arith.index_cast %arg0 : i32 to index
    %4 = memref.load %arg3[%3] : memref<2xi32, #tpu.memory_space<smem>>
    %5 = arith.cmpi slt, %arg2, %4 : i32
    %6 = arith.extui %5 : i1 to i32
    %c0_i32_1 = arith.constant 0 : i32
    %7 = arith.cmpi ne, %6, %c0_i32_1 : i32
    scf.if %7 {
      %c0 = arith.constant 0 : index
      %c0_4 = arith.constant 0 : index
      %11 = vector.load %arg12[%c0, %c0_4] : memref<128x32xbf16, #tpu.memory_space<vmem>>, vector<128x32xbf16>
      %c0_5 = arith.constant 0 : index
      %c0_6 = arith.constant 0 : index
      %c0_7 = arith.constant 0 : index
      %12 = vector.load %arg6[%c0_5, %c0_6, %c0_7] : memref<1x128x32xf32, #tpu.memory_space<vmem>>, vector<1x128x32xf32>
      %13 = vector.shape_cast %12 : vector<1x128x32xf32> to vector<128x32xf32>
      %14 = arith.truncf %13 : vector<128x32xf32> to vector<128x32xbf16>
      %c0_8 = arith.constant 0 : index
      %c0_9 = arith.constant 0 : index
      %c0_10 = arith.constant 0 : index
      %15 = vector.load %arg7[%c0_8, %c0_9, %c0_10] : memref<1x128x32xf32, #tpu.memory_space<vmem>>, vector<1x128x32xf32>
      %16 = vector.shape_cast %15 : vector<1x128x32xf32> to vector<128x32xf32>
      %17 = arith.truncf %16 : vector<128x32xf32> to vector<128x32xbf16>
      %cst = arith.constant dense<0.000000e+00> : vector<128x128xf32>
      %18 = tpu.matmul %11, %14, %cst {dimension_numbers = #tpu.dot_dimension_numbers<[1], [1], [0], [0], [0, 0, 1, 0], [], []>} : vector<128x32xbf16>, vector<128x32xbf16>, vector<128x128xf32> -> vector<128x128xf32>
      %19 = tpu.iota {dimensions = array<i32: 1>} : vector<128x128xi32>
      %c128_i32 = arith.constant 128 : i32
      %20 = arith.muli %arg2, %c128_i32 : i32
      %21 = vector.broadcast %20 : i32 to vector<128x128xi32>
      %22 = arith.addi %19, %21 : vector<128x128xi32>
      %c8_i32 = arith.constant 8 : i32
      %23 = vector.broadcast %c8_i32 : i32 to vector<128x128xi32>
      %24 = arith.cmpi slt, %22, %23 : vector<128x128xi32>
      %cst_11 = arith.constant -1.000000e+06 : f32
      %cst_12 = arith.constant 0xFF800000 : f32
      %25 = vector.broadcast %cst_11 : f32 to vector<128x128xf32>
      %26 = vector.broadcast %cst_12 : f32 to vector<128x128xf32>
      %27 = arith.select %24, %25, %26 : vector<128x128xi1>, vector<128x128xf32>
      %c0_13 = arith.constant 0 : index
      %c0_14 = arith.constant 0 : index
      %c0_15 = arith.constant 0 : index
      %28 = vector.load %arg4[%c0_13, %c0_14, %c0_15] : memref<1x128x1xi32, #tpu.memory_space<vmem>>, vector<1x128x1xi32>
      %29 = vector.shape_cast %28 : vector<1x128x1xi32> to vector<128x1xi32>
      %30 = vector.broadcast %29 : vector<128x1xi32> to vector<128x128xi32>
      %31 = arith.cmpi slt, %22, %30 : vector<128x128xi32>
      %32 = arith.select %31, %18, %27 : vector<128x128xi1>, vector<128x128xf32>
      %c0_16 = arith.constant 0 : index
      %c0_17 = arith.constant 0 : index
      %33 = vector.load %arg9[%c0_16, %c0_17] : memref<128x1xf32, #tpu.memory_space<vmem>>, vector<128x1xf32>
      %cst_18 = arith.constant dense<0xFF800000> : vector<128xf32>
      %34 = vector.multi_reduction <maximumf>, %32, %cst_18 [1] : vector<128x128xf32> to vector<128xf32>
      %35 = vector.shape_cast %34 : vector<128xf32> to vector<128x1xf32>
      %36 = arith.maximumf %33, %35 : vector<128x1xf32>
      %37 = arith.subf %33, %36 : vector<128x1xf32>
      %38 = math.exp %37 : vector<128x1xf32>
      %39 = vector.broadcast %36 : vector<128x1xf32> to vector<128x128xf32>
      %40 = arith.subf %32, %39 : vector<128x128xf32>
      %41 = math.exp %40 : vector<128x128xf32>
      %c0_19 = arith.constant 0 : index
      %c0_20 = arith.constant 0 : index
      %42 = vector.load %arg10[%c0_19, %c0_20] : memref<128x1xf32, #tpu.memory_space<vmem>>, vector<128x1xf32>
      %43 = arith.mulf %38, %42 : vector<128x1xf32>
      %cst_21 = arith.constant dense<0.000000e+00> : vector<128xf32>
      %44 = vector.multi_reduction <add>, %41, %cst_21 [1] : vector<128x128xf32> to vector<128xf32>
      %45 = vector.shape_cast %44 : vector<128xf32> to vector<128x1xf32>
      %46 = arith.addf %43, %45 : vector<128x1xf32>
      %c0_22 = arith.constant 0 : index
      %c0_23 = arith.constant 0 : index
      %47 = vector.load %arg10[%c0_22, %c0_23] : memref<128x1xf32, #tpu.memory_space<vmem>>, vector<128x1xf32>
      tpu.vector_store %arg10[%c0_22, %c0_23], %46 {strides = array<i32>} : memref<128x1xf32, #tpu.memory_space<vmem>>, vector<128x1xf32>,
      %c0_24 = arith.constant 0 : index
      %c0_25 = arith.constant 0 : index
      %48 = vector.load %arg11[%c0_24, %c0_25] : memref<128x32xf32, #tpu.memory_space<vmem>>, vector<128x32xf32>
      %49 = vector.broadcast %38 : vector<128x1xf32> to vector<128x32xf32>
      %50 = arith.mulf %49, %48 : vector<128x32xf32>
      %51 = arith.truncf %41 : vector<128x128xf32> to vector<128x128xbf16>
      %cst_26 = arith.constant dense<0.000000e+00> : vector<128x32xf32>
      %52 = tpu.matmul %51, %17, %cst_26 {dimension_numbers = #tpu.dot_dimension_numbers<[1], [0], [0], [1], [0, 0, 1, 1], [], []>} : vector<128x128xbf16>, vector<128x32xbf16>, vector<128x32xf32> -> vector<128x32xf32>
      %53 = arith.addf %50, %52 : vector<128x32xf32>
      %c0_27 = arith.constant 0 : index
      %c0_28 = arith.constant 0 : index
      %54 = vector.load %arg11[%c0_27, %c0_28] : memref<128x32xf32, #tpu.memory_space<vmem>>, vector<128x32xf32>
      tpu.vector_store %arg11[%c0_27, %c0_28], %53 {strides = array<i32>} : memref<128x32xf32, #tpu.memory_space<vmem>>, vector<128x32xf32>,
      %c0_29 = arith.constant 0 : index
      %c0_30 = arith.constant 0 : index
      %55 = vector.load %arg9[%c0_29, %c0_30] : memref<128x1xf32, #tpu.memory_space<vmem>>, vector<128x1xf32>
      tpu.vector_store %arg9[%c0_29, %c0_30], %36 {strides = array<i32>} : memref<128x1xf32, #tpu.memory_space<vmem>>, vector<128x1xf32>,
    } else {
    }
    %c0_i32_2 = arith.constant 0 : i32
    %8 = arith.cmpi eq, %arg2, %c0_i32_2 : i32
    %9 = arith.extui %8 : i1 to i32
    %c0_i32_3 = arith.constant 0 : i32
    %10 = arith.cmpi ne, %9, %c0_i32_3 : i32
    scf.if %10 {
      %c0 = arith.constant 0 : index
      %c0_4 = arith.constant 0 : index
      %11 = vector.load %arg10[%c0, %c0_4] : memref<128x1xf32, #tpu.memory_space<vmem>>, vector<128x1xf32>
      %cst = arith.constant 1.000000e+00 : f32
      %12 = vector.broadcast %cst : f32 to vector<128x1xf32>
      %13 = arith.divf %12, %11 : vector<128x1xf32>
      %c0_5 = arith.constant 0 : index
      %c0_6 = arith.constant 0 : index
      %14 = vector.load %arg11[%c0_5, %c0_6] : memref<128x32xf32, #tpu.memory_space<vmem>>, vector<128x32xf32>
      %15 = vector.broadcast %13 : vector<128x1xf32> to vector<128x32xf32>
      %16 = arith.mulf %14, %15 : vector<128x32xf32>
      %c0_7 = arith.constant 0 : index
      %c0_8 = arith.constant 0 : index
      %c0_9 = arith.constant 0 : index
      %17 = vector.load %arg8[%c0_7, %c0_8, %c0_9] : memref<1x128x32xf32, #tpu.memory_space<vmem>>, vector<1x128x32xf32>
      %18 = vector.shape_cast %17 : vector<1x128x32xf32> to vector<128x32xf32>
      %19 = vector.shape_cast %16 : vector<128x32xf32> to vector<1x128x32xf32>
      tpu.vector_store %arg8[%c0_7, %c0_8, %c0_9], %19 {strides = array<i32>} : memref<1x128x32xf32, #tpu.memory_space<vmem>>, vector<1x128x32xf32>,
    } else {
    }
    return
  }
  func.func @transform_0(%arg0: i32, %arg1: i32, %arg2: i32, %arg3: memref<2xi32, #tpu.memory_space<smem>>) -> (i32, i32, i32) {
    %c0_i32 = arith.constant 0 : i32
    %c0_i32_0 = arith.constant 0 : i32
    return %arg0, %arg1, %c0_i32 : i32, i32, i32
  }
  func.func @transform_1(%arg0: i32, %arg1: i32, %arg2: i32, %arg3: memref<2xi32, #tpu.memory_space<smem>>) -> (i32, i32, i32) {
    %c0_i32 = arith.constant 0 : i32
    %c0_i32_0 = arith.constant 0 : i32
    return %arg0, %arg1, %c0_i32 : i32, i32, i32
  }
  func.func @transform_2(%arg0: i32, %arg1: i32, %arg2: i32, %arg3: memref<2xi32, #tpu.memory_space<smem>>) -> (i32, i32, i32) {
    %0 = arith.index_cast %arg0 : i32 to index
    %1 = memref.load %arg3[%0] : memref<2xi32, #tpu.memory_space<smem>>
    %c1_i32 = arith.constant 1 : i32
    %2 = arith.subi %1, %c1_i32 : i32
    %3 = arith.minsi %arg2, %2 : i32
    %c0_i32 = arith.constant 0 : i32
    %c0_i32_0 = arith.constant 0 : i32
    return %arg0, %3, %c0_i32 : i32, i32, i32
  }
  func.func @transform_3(%arg0: i32, %arg1: i32, %arg2: i32, %arg3: memref<2xi32, #tpu.memory_space<smem>>) -> (i32, i32, i32) {
    %0 = arith.index_cast %arg0 : i32 to index
    %1 = memref.load %arg3[%0] : memref<2xi32, #tpu.memory_space<smem>>
    %c1_i32 = arith.constant 1 : i32
    %2 = arith.subi %1, %c1_i32 : i32
    %3 = arith.minsi %arg2, %2 : i32
    %c0_i32 = arith.constant 0 : i32
    %c0_i32_0 = arith.constant 0 : i32
    return %arg0, %3, %c0_i32 : i32, i32, i32
  }
  func.func @transform_4(%arg0: i32, %arg1: i32, %arg2: i32, %arg3: memref<2xi32, #tpu.memory_space<smem>>) -> (i32, i32, i32) {
    %c0_i32 = arith.constant 0 : i32
    %c0_i32_0 = arith.constant 0 : i32
    return %arg0, %arg1, %c0_i32 : i32, i32, i32
  }
}

</mosaic_0001>

<bundles_post_ra>
// kernel: dot_product_attention.1
= control target key start
LH: loop header
LB: loop body
LE: loop exit
PB: predicated region body
PF: predicated region fallthrough
CT: control target
= control target key end

     0   :  { %s2744_s0 = inlined_call_operand.vmem [shape: s32[2], index: 0, kind: input, shape index: {}]   ;;  %s2745_s1 = inlined_call_operand.vmem [shape: s32[2,128,1], index: 1, kind: input, shape index: {}]   ;;  %s2746_s2 = inlined_call_operand.vmem [shape: f32[2,128,32], index: 2, kind: input, shape index: {}]   ;;  %s2747_s3 = inlined_call_operand.vmem [shape: f32[2,128,32], index: 3, kind: input, shape index: {}]   ;;  %s2748_s4 = inlined_call_operand.vmem [shape: f32[2,128,32], index: 4, kind: input, shape index: {}]   ;;  %s2749_s5 = inlined_call_operand.vmem [shape: f32[2,128,32], index: 5, kind: output, shape index: {}]  }
   0x1   :  { %s10_s20 = sshll.u32 %s2744_s0, 4  ;;  %s11_s20 = int_to_ptr.vmem [resolvable:$true] %s10_s20 }
   0x2   :  { %s2032_s21 = scalar_lea.vmem %s11_s20, 16  ;;  %p2037_p1 = scmp.lt.s32.totalorder %s11_s20, %s11_s20 }
   0x3   :  { %p2033_p0 = scmp.ne.s32.totalorder %s11_s20, %s2032_s21  ;;  %p2038_p2 = scmp.lt.s32.totalorder %s2032_s21, %s2032_s21 }
   0x5   :  { %p2039_p3 = por %p2038_p2, %p2037_p1 }
   0x7   :  { %p2040_p4 = pnand %p2039_p3, %p2033_p0 }
   0x9   :  { %2043 = shalt.err (!%p2040_p4)  }
   0xa   :  { %s2070_s22 = smov [#allocation7]  }
   0xb   :  { %13 = dma.vmem_to_smem %s11_s20, 16, %s2070_s22, [#allocation6] }
   0xc   :  { %2056 = dma.done.wait [#allocation6], 16 }
   0xd   :  { %2057 = vsyncadd [#allocation6], 4294967280 }
   0xe   :  { %15 = sfence }
   0xf   :  { %s2109_s23 = smov 0   ;;  %s2111_s24 = smov 0  }
  0x10   :  { %s2113_s25 = smov 0  }
  0x11 LB: > { %s40_s0 = sadd.s32 1, %s2064_s24  ;;  %p1766_p5 = scmp.ge.s32.totalorder %s2068_s25, 1  ;;  %s2068_s25 = sphi %s2113_s25, %s21_s25   ;;  %s2064_s24 = sphi %s2111_s24, %s2751_s24   ;;  %s2060_s23 = sphi %s2109_s23, %s2750_s23  }
  0x12   : > { %p42_p6 = scmp.ge.s32.totalorder %s40_s0, 2  ;;  %p280_p7 = scmp.lt.s32.totalorder %s2068_s25, 3 }
  0x14   : > { %s2753_s0 = smov (%p42_p6, %s40_s0), 0  ;;  %p281_p8 = pnand %p1766_p5, %p280_p7 }
  0x15   : > { %vm420_vm0 = vcmask (!%p281_p8), 7168   ;;  %s2130_s26 = sld [smem:[#allocation7 + %s2060_s23]] (!%p281_p8)  ;;  %vm453_vm1 = vcmask (!%p281_p8), 261120   ;;  %p350_p9 = scmp.lt.s32.totalorder (!%p281_p8), %s2060_s23, 1  ;;  %v2071_v0 = vmov (!%p281_p8), -inf   ;;  %v2072_v1 = vmov (!%p281_p8), 0.0  }
  0x16   : > { %284 = sbr.rel (%p281_p8) target bundleno = 1039 (0x40f), region = 36  ;;  %421 = vst.msk [vmem:[#allocation2] sm:$0xff] (!%p281_p8), %vm420_vm0, %v2071_v0  ;;  %422 = vst.msk [vmem:[#allocation2 + $0x8] sm:$0xff] (!%p281_p8), %vm420_vm0, %v2071_v0  ;;  %s369_s27 = sld [smem:[#allocation7 + %s2060_s23]] (!%p281_p8) }
  0x17   : > { %423 = vst.msk [vmem:[#allocation2 + $0x10] sm:$0xff] (!%p281_p8), %vm420_vm0, %v2071_v0  ;;  %424 = vst.msk [vmem:[#allocation2 + $0x18] sm:$0xff] (!%p281_p8), %vm420_vm0, %v2071_v0  ;;  %s387_s28 = sld [smem:[#allocation7 + %s2060_s23]] (!%p281_p8) }
  0x18   : > { %425 = vst.msk [vmem:[#allocation2 + $0x20] sm:$0xff] (!%p281_p8), %vm420_vm0, %v2071_v0  ;;  %426 = vst.msk [vmem:[#allocation2 + $0x28] sm:$0xff] (!%p281_p8), %vm420_vm0, %v2071_v0 }
  0x19   : > { %427 = vst.msk [vmem:[#allocation2 + $0x30] sm:$0xff] (!%p281_p8), %vm420_vm0, %v2071_v0  ;;  %428 = vst.msk [vmem:[#allocation2 + $0x38] sm:$0xff] (!%p281_p8), %vm420_vm0, %v2071_v0 }
  0x1a   : > { %429 = vst.msk [vmem:[#allocation2 + $0x40] sm:$0xff] (!%p281_p8), %vm420_vm0, %v2071_v0  ;;  %430 = vst.msk [vmem:[#allocation2 + $0x48] sm:$0xff] (!%p281_p8), %vm420_vm0, %v2071_v0 }
  0x1b   : > { %431 = vst.msk [vmem:[#allocation2 + $0x50] sm:$0xff] (!%p281_p8), %vm420_vm0, %v2071_v0  ;;  %432 = vst.msk [vmem:[#allocation2 + $0x58] sm:$0xff] (!%p281_p8), %vm420_vm0, %v2071_v0  ;;  %p1784_p0 = scmp.le.s32.totalorder (!%p281_p8), %s2130_s26, 0 }
  0x1c   : > { %433 = vst.msk [vmem:[#allocation2 + $0x60] sm:$0xff] (!%p281_p8), %vm420_vm0, %v2071_v0  ;;  %434 = vst.msk [vmem:[#allocation2 + $0x68] sm:$0xff] (!%p281_p8), %vm420_vm0, %v2071_v0  ;;  %s1771_s14 = sadd.s32 (!%p281_p8), 4294967295, %s369_s27 }
  0x1d   : > { %435 = vst.msk [vmem:[#allocation2 + $0x70] sm:$0xff] %vm420_vm0, %v2071_v0  ;;  %436 = vst.msk [vmem:[#allocation2 + $0x78] sm:$0xff] %vm420_vm0, %v2071_v0  ;;  %s2755_s23 = smov (!%p350_p9, %s2060_s23), 1  ;;  %s1776_s15 = sadd.s32 4294967295, %s387_s28  ;;  %v2073_v47 = vmov (!%p1784_p0), 0  }
  0x1e   : > { %437 = vst.msk [vmem:[#allocation3] sm:$0xff] %vm420_vm0, %v2072_v1  ;;  %438 = vst.msk [vmem:[#allocation3 + $0x8] sm:$0xff] %vm420_vm0, %v2072_v1  ;;  %s1795_s29 = sshll.u32 %s2755_s23, 7  ;;  %p1772_p10 = scmp.gt.s32.totalorder %s1771_s14, 0  ;;  %1932 = vset.pattern.permute.xlu0 (!%p1784_p0), %v2073_v47  ;;  %1933 = vset.pattern.permute.xlu1 (!%p1784_p0), %v2073_v47 }
  0x1f   : > { %439 = vst.msk [vmem:[#allocation3 + $0x10] sm:$0xff] %vm420_vm0, %v2072_v1  ;;  %440 = vst.msk [vmem:[#allocation3 + $0x18] sm:$0xff] %vm420_vm0, %v2072_v1  ;;  %s2192_s7 = scalar_lea.vmem %s2745_s1, %s1795_s29  ;;  %s2197_s10 = scalar_lea.vmem %s2746_s2, %s1795_s29 }
  0x20   : > { %441 = vst.msk [vmem:[#allocation3 + $0x20] sm:$0xff] %vm420_vm0, %v2072_v1  ;;  %442 = vst.msk [vmem:[#allocation3 + $0x28] sm:$0xff] %vm420_vm0, %v2072_v1  ;;  %s2202_s13 = scalar_lea.vmem %s2749_s5, %s1795_s29  ;;  %v470_v2 = vld [vmem:[%s2197_s10] sm:$0xff]  ;;  %v471_v3 = vld [vmem:[%s2197_s10 + $0x8] sm:$0xff]  ;;  %p1777_p11 = scmp.gt.s32.totalorder %s1776_s15, 0 }
  0x21   : > { %443 = vst.msk [vmem:[#allocation3 + $0x30] sm:$0xff] %vm420_vm0, %v2072_v1  ;;  %444 = vst.msk [vmem:[#allocation3 + $0x38] sm:$0xff] %vm420_vm0, %v2072_v1  ;;  %v472_v4 = vld [vmem:[%s2197_s10 + $0x10] sm:$0xff]  ;;  %v486_v5 = vmul.f32 0.17677669, %v470_v2  ;;  %v473_v7 = vld [vmem:[%s2197_s10 + $0x18] sm:$0xff] }
  0x22   : > { %445 = vst.msk [vmem:[#allocation3 + $0x40] sm:$0xff] %vm420_vm0, %v2072_v1  ;;  %446 = vst.msk [vmem:[#allocation3 + $0x48] sm:$0xff] %vm420_vm0, %v2072_v1  ;;  %v487_v6 = vmul.f32 0.17677669, %v471_v3  ;;  %v488_v8 = vmul.f32 0.17677669, %v472_v4 }
  0x23   : > { %447 = vst.msk [vmem:[#allocation3 + $0x50] sm:$0xff] %vm420_vm0, %v2072_v1  ;;  %448 = vst.msk [vmem:[#allocation3 + $0x58] sm:$0xff] %vm420_vm0, %v2072_v1  ;;  %v474_v9 = vld [vmem:[%s2197_s10 + $0x20] sm:$0xff]  ;;  %v489_v11 = vmul.f32 0.17677669, %v473_v7  ;;  %v475_v12 = vld [vmem:[%s2197_s10 + $0x28] sm:$0xff] }
  0x24   : > { %449 = vst.msk [vmem:[#allocation3 + $0x60] sm:$0xff] %vm420_vm0, %v2072_v1  ;;  %450 = vst.msk [vmem:[#allocation3 + $0x68] sm:$0xff] %vm420_vm0, %v2072_v1  ;;  %v502_v10 = vpack.c.bf16 %v487_v6, %v486_v5  ;;  %v490_v13 = vmul.f32 0.17677669, %v474_v9  ;;  %v476_v14 = vld [vmem:[%s2197_s10 + $0x30] sm:$0xff]  ;;  %s2757_s14 = smov (%p1772_p10, %s1771_s14), 0 }
  0x25   : > { %451 = vst.msk [vmem:[#allocation3 + $0x70] sm:$0xff] %vm420_vm0, %v2072_v1  ;;  %452 = vst.msk [vmem:[#allocation3 + $0x78] sm:$0xff] %vm420_vm0, %v2072_v1  ;;  %v491_v15 = vmul.f32 0.17677669, %v475_v12  ;;  %v477_v16 = vld [vmem:[%s2197_s10 + $0x38] sm:$0xff]  ;;  %s2759_s15 = smov (%p1777_p11, %s1776_s15), 0  ;;  %v503_v18 = vpack.c.bf16 %v489_v11, %v488_v8 }
  0x26   : > { %454 = vst.msk [vmem:[#allocation4] sm:$0xff] %vm453_vm1, %v2072_v1  ;;  %455 = vst.msk [vmem:[#allocation4 + $0x8] sm:$0xff] %vm453_vm1, %v2072_v1  ;;  %v492_v17 = vmul.f32 0.17677669, %v476_v14  ;;  %v493_v19 = vmul.f32 0.17677669, %v477_v16 }
  0x27   : > { %456 = vst.msk [vmem:[#allocation4 + $0x10] sm:$0xff] %vm453_vm1, %v2072_v1  ;;  %457 = vst.msk [vmem:[#allocation4 + $0x18] sm:$0xff] %vm453_vm1, %v2072_v1  ;;  %v478_v20 = vld [vmem:[%s2197_s10 + $0x40] sm:$0xff]  ;;  %v479_v21 = vld [vmem:[%s2197_s10 + $0x48] sm:$0xff]  ;;  %s1773_s16 = sshll.u32 %s2757_s14, 4  ;;  %v504_v23 = vpack.c.bf16 %v491_v15, %v490_v13  ;;  %s1778_s17 = sshll.u32 %s2759_s15, 4 }
  0x28   : > { %458 = vst.msk [vmem:[#allocation4 + $0x20] sm:$0xff] %vm453_vm1, %v2072_v1  ;;  %459 = vst.msk [vmem:[#allocation4 + $0x28] sm:$0xff] %vm453_vm1, %v2072_v1  ;;  %v480_v22 = vld [vmem:[%s2197_s10 + $0x50] sm:$0xff]  ;;  %v494_v24 = vmul.f32 0.17677669, %v478_v20  ;;  %v481_v26 = vld [vmem:[%s2197_s10 + $0x58] sm:$0xff]  ;;  %v505_v27 = vpack.c.bf16 %v493_v19, %v492_v17 }
  0x29   : > { %460 = vst.msk [vmem:[#allocation4 + $0x30] sm:$0xff] %vm453_vm1, %v2072_v1  ;;  %461 = vst.msk [vmem:[#allocation4 + $0x38] sm:$0xff] %vm453_vm1, %v2072_v1  ;;  %v495_v25 = vmul.f32 0.17677669, %v479_v21  ;;  %p376_p12 = scmp.lt.s32.totalorder %s1773_s16, 15  ;;  %s1774_s18 = sshll.u32 %s2755_s23, 4 }
  0x2a   : > { %462 = vst.msk [vmem:[#allocation4 + $0x40] sm:$0xff] %vm453_vm1, %v2072_v1  ;;  %463 = vst.msk [vmem:[#allocation4 + $0x48] sm:$0xff] %vm453_vm1, %v2072_v1  ;;  %v496_v28 = vmul.f32 0.17677669, %v480_v22  ;;  %v497_v29 = vmul.f32 0.17677669, %v481_v26 }
  0x2b   : > { %464 = vst.msk [vmem:[#allocation4 + $0x50] sm:$0xff] %vm453_vm1, %v2072_v1  ;;  %465 = vst.msk [vmem:[#allocation4 + $0x58] sm:$0xff] %vm453_vm1, %v2072_v1  ;;  %p394_p13 = scmp.lt.s32.totalorder %s1778_s17, 15  ;;  %v506_v30 = vpack.c.bf16 %v495_v25, %v494_v24  ;;  %v482_v31 = vld [vmem:[%s2197_s10 + $0x60] sm:$0xff]  ;;  %v483_v32 = vld [vmem:[%s2197_s10 + $0x68] sm:$0xff]  ;;  %s2761_s16 = smov (!%p376_p12, %s1773_s16), 15 }
  0x2c   : > { %466 = vst.msk [vmem:[#allocation4 + $0x60] sm:$0xff] %vm453_vm1, %v2072_v1  ;;  %467 = vst.msk [vmem:[#allocation4 + $0x68] sm:$0xff] %vm453_vm1, %v2072_v1  ;;  %v484_v33 = vld [vmem:[%s2197_s10 + $0x70] sm:$0xff]  ;;  %v507_v34 = vpack.c.bf16 %v497_v29, %v496_v28  ;;  %v498_v35 = vmul.f32 0.17677669, %v482_v31  ;;  %v485_v37 = vld [vmem:[%s2197_s10 + $0x78] sm:$0xff]  ;;  %s379_s19 = sadd.s32 %s1774_s18, %s2761_s16 }
  0x2d   : > { %468 = vst.msk [vmem:[#allocation4 + $0x70] sm:$0xff] %vm453_vm1, %v2072_v1  ;;  %469 = vst.msk [vmem:[#allocation4 + $0x78] sm:$0xff] %vm453_vm1, %v2072_v1  ;;  %v499_v36 = vmul.f32 0.17677669, %v483_v32  ;;  %s2763_s17 = smov (!%p394_p13, %s1778_s17), 15  ;;  %s1775_s20 = sshll.u32 %s379_s19, 3 }
  0x2e   : > { %510 = vst.msk [vmem:[#allocation5] sm:$0xff] %vm453_vm1, %v502_v10  ;;  %511 = vst.msk [vmem:[#allocation5 + $0x8] sm:$0xff] %vm453_vm1, %v503_v18  ;;  %v500_v38 = vmul.f32 0.17677669, %v484_v33  ;;  %v501_v39 = vmul.f32 0.17677669, %v485_v37  ;;  %s397_s21 = sadd.s32 %s1774_s18, %s2763_s17  ;;  %s2236_s27 = scalar_lea.vmem %s2747_s3, %s1775_s20 }
  0x2f   : > { %512 = vst.msk [vmem:[#allocation5 + $0x10] sm:$0xff] %vm453_vm1, %v504_v23  ;;  %513 = vst.msk [vmem:[#allocation5 + $0x18] sm:$0xff] %vm453_vm1, %v505_v27  ;;  %v508_v40 = vpack.c.bf16 %v499_v36, %v498_v35  ;;  %s1780_s28 = sshll.u32 %s397_s21, 3  ;;  %522 = sbr.rel (%p1784_p0) target bundleno = 867 (0x363), region = 44  ;;  %v531_v42 = vld [vmem:[%s2236_s27] sm:$0xff] (!%p1784_p0)  ;;  %v532_v43 = vld [vmem:[%s2236_s27 + $0x8] sm:$0xff] (!%p1784_p0)  ;;  %v725_v36 = vlaneseq (!%p1784_p0) }
  0x30   : > { %514 = vst.msk [vmem:[#allocation5 + $0x20] sm:$0xff] %vm453_vm1, %v506_v30  ;;  %515 = vst.msk [vmem:[#allocation5 + $0x28] sm:$0xff] %vm453_vm1, %v507_v34  ;;  %v509_v41 = vpack.c.bf16 %v501_v39, %v500_v38  ;;  %s2242_s6 = scalar_lea.vmem %s2748_s4, %s1780_s28  ;;  %v533_v44 = vld [vmem:[%s2236_s27 + $0x10] sm:$0xff] (!%p1784_p0)  ;;  %v547_v45 = vpack.c.bf16 (!%p1784_p0), %v532_v43, %v531_v42  ;;  %v534_v46 = vld [vmem:[%s2236_s27 + $0x18] sm:$0xff] (!%p1784_p0)  ;;  %v2074_v42 = vmov (!%p1784_p0), -inf  }
  0x31   : > { %516 = vst.msk [vmem:[#allocation5 + $0x30] sm:$0xff] %vm453_vm1, %v508_v40  ;;  %v548_v48 = vpack.c.bf16 (!%p1784_p0), %v534_v46, %v533_v44  ;;  %v535_v51 = vld [vmem:[%s2236_s27 + $0x20] sm:$0xff] (!%p1784_p0)  ;;  %v536_v52 = vld [vmem:[%s2236_s27 + $0x28] sm:$0xff] (!%p1784_p0)  ;;  %v734_v54 = vld [vmem:[%s2192_s7 + $0x10] sm:$0xff] (!%p1784_p0)  ;;  %v2302_v39 = vand.u32 (!%p1784_p0), 127, %v725_v36 }
  0x32   : > { %517 = vst.msk [vmem:[#allocation5 + $0x38] sm:$0xff] %vm453_vm1, %v509_v41  ;;  %1894 = vmatprep.subr.msk.bf16.mxu0 (!%p1784_p0), %vm453_vm1, %v547_v45  ;;  %v605_v49 = vsel (!%p1784_p0), %vm453_vm1, %v547_v45, 0  ;;  %v732_v53 = vld [vmem:[%s2192_s7] sm:$0xff] (!%p1784_p0)  ;;  %v549_v56 = vpack.c.bf16 (!%p1784_p0), %v536_v52, %v535_v51  ;;  %755 = vperm.xlu1 (!%p1784_p0), %1933, %v734_v54   ;;  %v733_v57 = vld [vmem:[%s2192_s7 + $0x8] sm:$0xff] (!%p1784_p0)  ;;  %v735_v58 = vld [vmem:[%s2192_s7 + $0x18] sm:$0xff] (!%p1784_p0) }
  0x33   : > { %1831 = vmatpush3.bf16.xpose.msra.mxu0 (!%p1784_p0), %v605_v49  ;;  %v608_v55 = vsel (!%p1784_p0), %vm453_vm1, %v548_v48, 0  ;;  %749 = vperm.xlu0 (!%p1784_p0), %1932, %v732_v53   ;;  %v537_v59 = vld [vmem:[%s2236_s27 + $0x30] sm:$0xff] (!%p1784_p0)  ;;  %v538_v60 = vld [vmem:[%s2236_s27 + $0x38] sm:$0xff] (!%p1784_p0)  ;;  %v736_v61 = vld [vmem:[%s2192_s7 + $0x20] sm:$0xff] (!%p1784_p0)  ;;  %vm730_vm2 = vcmp.lt.s32.totalorder (!%p1784_p0), %v2302_v39, 8 }
  0x34   : > { %1895 = vmatprep.subr.msk.bf16.mxu0 (!%p1784_p0), %vm453_vm1, %v548_v48  ;;  %v737_v62 = vld [vmem:[%s2192_s7 + $0x28] sm:$0xff] (!%p1784_p0)  ;;  %v611_v63 = vsel (!%p1784_p0), %vm453_vm1, %v549_v56, 0  ;;  %v550_v0 = vpack.c.bf16 (!%p1784_p0), %v538_v60, %v537_v59  ;;  %v738_v1 = vld [vmem:[%s2192_s7 + $0x30] sm:$0xff] (!%p1784_p0)  ;;  %v739_v2 = vld [vmem:[%s2192_s7 + $0x38] sm:$0xff] (!%p1784_p0)  ;;  %v2306_v43 = vsel (!%p1784_p0), %vm730_vm2, -1000000.0, %v2074_v42 }
  0x35   : > { %v523_v50 = vld [vmem:[#allocation5] sm:$0xff] (!%p1784_p0)  ;;  %v540_v4 = vld [vmem:[%s2236_s27 + $0x48] sm:$0xff] (!%p1784_p0)  ;;  %v742_v9 = vld [vmem:[%s2192_s7 + $0x50] sm:$0xff] (!%p1784_p0) }
  0x36   : > { %1846 = vmatprep.mubr.msk.bf16.mxu0 %vm453_vm1, %v523_v50  ;;  %758 = vperm.xlu1 %1933, %v735_v58   ;;  %v539_v3 = vld [vmem:[%s2236_s27 + $0x40] sm:$0xff]  ;;  %v741_v6 = vld [vmem:[%s2192_s7 + $0x48] sm:$0xff]  ;;  %v614_v7 = vsel %vm453_vm1, %v550_v0, 0  ;;  %v743_v10 = vld [vmem:[%s2192_s7 + $0x58] sm:$0xff] }
  0x37   : > { %752 = vperm.xlu0 %1932, %v733_v57   ;;  %v740_v5 = vld [vmem:[%s2192_s7 + $0x40] sm:$0xff]  ;;  %v551_v8 = vpack.c.bf16 %v540_v4, %v539_v3  ;;  %v541_v11 = vld [vmem:[%s2236_s27 + $0x50] sm:$0xff]  ;;  %v542_v12 = vld [vmem:[%s2236_s27 + $0x58] sm:$0xff] }
  0x38   : > { %v744_v13 = vld [vmem:[%s2192_s7 + $0x60] sm:$0xff]  ;;  %v745_v14 = vld [vmem:[%s2192_s7 + $0x68] sm:$0xff]  ;;  %v552_v16 = vpack.c.bf16 %v542_v12, %v541_v11  ;;  %v746_v17 = vld [vmem:[%s2192_s7 + $0x70] sm:$0xff] }
  0x39   : > { %v617_v15 = vsel %vm453_vm1, %v551_v8, 0  ;;  %v747_v18 = vld [vmem:[%s2192_s7 + $0x78] sm:$0xff]  ;;  %v543_v19 = vld [vmem:[%s2236_s27 + $0x60] sm:$0xff]  ;;  %v544_v20 = vld [vmem:[%s2236_s27 + $0x68] sm:$0xff] }
  0x3a   : > { %764 = vperm.xlu1 %1933, %v737_v62   ;;  %v620_v21 = vsel %vm453_vm1, %v552_v16, 0  ;;  %v553_v22 = vpack.c.bf16 %v544_v20, %v543_v19  ;;  %v545_v23 = vld [vmem:[%s2236_s27 + $0x70] sm:$0xff]  ;;  %v546_v24 = vld [vmem:[%s2236_s27 + $0x78] sm:$0xff]  ;;  %v524_v28 = vld [vmem:[#allocation5 + $0x8] sm:$0xff] }
  0x3b   : > { %1833 = vmatpush3.bf16.xpose.msra.mxu0 %v608_v55  ;;  %761 = vperm.xlu0 %1932, %v736_v61   ;;  %v554_v26 = vpack.c.bf16 %v546_v24, %v545_v23  ;;  %v525_v29 = vld [vmem:[#allocation5 + $0x10] sm:$0xff]  ;;  %v526_v30 = vld [vmem:[#allocation5 + $0x18] sm:$0xff]  ;;  %v527_v31 = vld [vmem:[#allocation5 + $0x20] sm:$0xff] }
  0x3c   : > { %1896 = vmatprep.subr.msk.bf16.mxu0 %vm453_vm1, %v549_v56  ;;  %v623_v25 = vsel %vm453_vm1, %v553_v22, 0  ;;  %v528_v32 = vld [vmem:[#allocation5 + $0x28] sm:$0xff]  ;;  %v529_v33 = vld [vmem:[#allocation5 + $0x30] sm:$0xff]  ;;  %v530_v34 = vld [vmem:[#allocation5 + $0x38] sm:$0xff] }
  0x3d   : > { %v626_v27 = vsel %vm453_vm1, %v554_v26, 0  ;;  %v555_v23 = vld [vmem:[%s2242_s6] sm:$0xff]  ;;  %v556_v24 = vld [vmem:[%s2242_s6 + $0x8] sm:$0xff] }
  0x3e   : > { %770 = vperm.xlu1 %1933, %v739_v2   ;;  %v560_v36 = vld [vmem:[%s2242_s6 + $0x28] sm:$0xff]  ;;  %v2416_v42 = vld [vmem:[#allocation2 + $0x20] sm:$0xff] }
  0x3f   : > { %767 = vperm.xlu0 %1932, %v738_v1  }
  0x42   : > { %776 = vperm.xlu1 %1933, %v741_v6  }
  0x43   : > { %1835 = vmatpush3.bf16.xpose.msra.mxu0 %v611_v63  ;;  %773 = vperm.xlu0 %1932, %v740_v5  }
  0x44   : > { %1897 = vmatprep.subr.msk.bf16.mxu0 %vm453_vm1, %v550_v0 }
  0x46   : > { %782 = vperm.xlu1 %1933, %v743_v10  }
  0x47   : > { %779 = vperm.xlu0 %1932, %v742_v9  }
  0x4a   : > { %788 = vperm.xlu1 %1933, %v745_v14  }
  0x4b   : > { %1837 = vmatpush3.bf16.xpose.msra.mxu0 %v614_v7  ;;  %785 = vperm.xlu0 %1932, %v744_v13  }
  0x4c   : > { %1898 = vmatprep.subr.msk.bf16.mxu0 %vm453_vm1, %v551_v8 }
  0x4e   : > { %794 = vperm.xlu1 %1933, %v747_v18  }
  0x4f   : > { %791 = vperm.xlu0 %1932, %v746_v17  }
  0x53   : > { %1839 = vmatpush3.bf16.xpose.msra.mxu0 %v617_v15 }
  0x54   : > { %1899 = vmatprep.subr.msk.bf16.mxu0 %vm453_vm1, %v552_v16 }
  0x5b   : > { %1841 = vmatpush3.bf16.xpose.msra.mxu0 %v620_v21 }
  0x5c   : > { %1900 = vmatprep.subr.msk.bf16.mxu0 %vm453_vm1, %v553_v22 }
  0x63   : > { %1843 = vmatpush3.bf16.xpose.msra.mxu0 %v623_v25  ;;  %v557_v25 = vld [vmem:[%s2242_s6 + $0x10] sm:$0xff] }
  0x64   : > { %1901 = vmatprep.subr.msk.bf16.mxu0 %vm453_vm1, %v554_v26  ;;  %v571_v26 = vpack.c.bf16 %v556_v24, %v555_v23  ;;  %v567_v23 = vld [vmem:[%s2242_s6 + $0x60] sm:$0xff]  ;;  %v568_v24 = vld [vmem:[%s2242_s6 + $0x68] sm:$0xff] }
  0x66   : > { %1862 = vmatprep.subr.bf16.mxu1 %v571_v26 }
  0x67   : > { %1863 = vmatpush3.bf16.msra.mxu1 %v571_v26  ;;  %v577_v26 = vpack.c.bf16 %v568_v24, %v567_v23 }
  0x6b   : > { %1845 = vmatpush3.bf16.xpose.msra.mxu0 %v626_v27  ;;  %v558_v27 = vld [vmem:[%s2242_s6 + $0x18] sm:$0xff] }
  0x72   : > { %1847 = vmatmul.mubr.msk.bf16.vlgmr.msra.gmra.mrb[0].mxu0 %vm453_vm1, %v524_v28  ;;  %v572_v28 = vpack.c.bf16 %v558_v27, %v557_v25 }
  0x73   : > { %1850 = vmatprep.mubr.msk.bf16.mxu0 %vm453_vm1, %v525_v29  ;;  %v2391_v29 = vld [vmem:[#allocation2] sm:$0xff] }
  0x74   : > { %1864 = vmatprep.subr.bf16.mxu1 %v572_v28 }
  0x75   : > { %1865 = vmatpush3.bf16.msra.mxu1 %v572_v28 }
  0x7a   : > { %1851 = vmatmul.mubr.msk.bf16.gmra.mrb[4].mxu0 %vm453_vm1, %v526_v30 }
  0x7b   : > { %1854 = vmatprep.mubr.msk.bf16.mxu0 %vm453_vm1, %v527_v31  ;;  %v2393_v31 = vld [vmem:[#allocation2 + $0x8] sm:$0xff] }
  0x82   : > { %1855 = vmatmul.mubr.msk.bf16.gmra.mrb[8].mxu0 %vm453_vm1, %v528_v32 }
  0x83   : > { %1858 = vmatprep.mubr.msk.bf16.mxu0 %vm453_vm1, %v529_v33 }
  0x8a   : > { %1859 = vmatmul.mubr.msk.bf16.gmra.mrb[12].mxu0 %vm453_vm1, %v530_v34  ;;  %v2398_v34 = vld [vmem:[#allocation2 + $0x10] sm:$0xff] }
  0xb1   : > { %v756_v37 = vpop.permute.xlu1 %755 }
  0xb2   : > { %v750_v35 = vpop.permute.xlu0 %749  ;;  %vm798_vm4 = vcmp.lt.s32.totalorder %v2302_v39, %v756_v37 }
  0xb3   : > { %vm796_vm3 = vcmp.lt.s32.totalorder %v2302_v39, %v750_v35  ;;  %v559_v35 = vld [vmem:[%s2242_s6 + $0x20] sm:$0xff] }
  0xb5   : > { %v759_v40 = vpop.permute.xlu1 %758 }
  0xb6   : > { %v753_v38 = vpop.permute.xlu0 %752  ;;  %vm799_vm6 = vcmp.lt.s32.totalorder %v2302_v39, %v759_v40 }
  0xb7   : > { %vm797_vm5 = vcmp.lt.s32.totalorder %v2302_v39, %v753_v38  ;;  %v573_v38 = vpack.c.bf16 %v560_v36, %v559_v35  ;;  %v2489_v35 = vld [vmem:[#allocation2 + $0x60] sm:$0xff]  ;;  %v569_v36 = vld [vmem:[%s2242_s6 + $0x70] sm:$0xff] }
  0xb9   : > { %v765_v44 = vpop.permute.xlu1 %764  ;;  %1866 = vmatprep.subr.bf16.mxu1 %v573_v38 }
  0xba   : > { %v762_v41 = vpop.permute.xlu0 %761  ;;  %vm801_vm8 = vcmp.lt.s32.totalorder %v2302_v39, %v765_v44  ;;  %1867 = vmatpush3.bf16.msra.mxu1 %v573_v38  ;;  %v562_v44 = vld [vmem:[%s2242_s6 + $0x38] sm:$0xff] }
  0xbb   : > { %vm800_vm7 = vcmp.lt.s32.totalorder %v2302_v39, %v762_v41  ;;  %v2414_v41 = vld [vmem:[#allocation2 + $0x18] sm:$0xff] }
  0xbd   : > { %v771_v52 = vpop.permute.xlu1 %770 }
  0xbe   : > { %v768_v47 = vpop.permute.xlu0 %767  ;;  %vm803_vm10 = vcmp.lt.s32.totalorder %v2302_v39, %v771_v52  ;;  %v2429_v52 = vld [vmem:[#allocation2 + $0x30] sm:$0xff] }
  0xbf   : > { %vm802_vm9 = vcmp.lt.s32.totalorder %v2302_v39, %v768_v47 }
  0xc1   : > { %v777_v61 = vpop.permute.xlu1 %776 }
  0xc2   : > { %v774_v54 = vpop.permute.xlu0 %773  ;;  %vm805_vm12 = vcmp.lt.s32.totalorder %v2302_v39, %v777_v61 }
  0xc3   : > { %vm804_vm11 = vcmp.lt.s32.totalorder %v2302_v39, %v774_v54  ;;  %v2431_v54 = vld [vmem:[#allocation2 + $0x28] sm:$0xff] }
  0xc5   : > { %v783_v3 = vpop.permute.xlu1 %782 }
  0xc6   : > { %v780_v62 = vpop.permute.xlu0 %779  ;;  %vm807_vm14 = vcmp.lt.s32.totalorder %v2302_v39, %v783_v3  ;;  %v2449_v3 = vld [vmem:[#allocation2 + $0x40] sm:$0xff] }
  0xc7   : > { %vm806_vm13 = vcmp.lt.s32.totalorder %v2302_v39, %v780_v62 }
  0xc9   : > { %v789_v11 = vpop.permute.xlu1 %788 }
  0xca   : > { %v786_v8 = vpop.permute.xlu0 %785  ;;  %vm809_vm2 = vcmp.lt.s32.totalorder %v2302_v39, %v789_v11 }
  0xcb   : > { %vm808_vm15 = vcmp.lt.s32.totalorder %v2302_v39, %v786_v8 }
  0xcd   : > { %v795_v19 = vpop.permute.xlu1 %794 }
  0xce   : > { %v792_v14 = vpop.permute.xlu0 %791 }
 0x145   : > { %v1848_v45 = vpop.f32.mrb[0].mxu0 }
 0x146   : > { %v662_v46 = vpop.f32.mrb[1].mxu0  ;;  %v2319_v53 = vsel %vm798_vm4, %v1848_v45, %v2306_v43  ;;  %vm811_vm4 = vcmp.lt.s32.totalorder %v2302_v39, %v795_v19  ;;  %v2469_v19 = vld [vmem:[#allocation2 + $0x48] sm:$0xff] }
 0x147   : > { %v1849_v48 = vpop.f32.mrb[2].mxu0  ;;  %v2309_v49 = vsel %vm796_vm3, %v662_v46, %v2306_v43  ;;  %vm810_vm3 = vcmp.lt.s32.totalorder %v2302_v39, %v792_v14 }
 0x148   : > { %844 = vmax.xlane.f32.xlu0 %v2309_v49  ;;  %v665_v50 = vpop.f32.mrb[3].mxu0  ;;  %v2325_v58 = vsel %vm799_vm6, %v1849_v48, %v2306_v43 }
 0x149   : > { %v2315_v51 = vsel %vm797_vm5, %v665_v50, %v2306_v43 }
 0x14a   : > { %846 = vmax.xlane.f32.xlu1 %v2315_v51 }
 0x14c   : > { %848 = vmax.xlane.f32.xlu0 %v2319_v53 }
 0x14d   : > { %v1852_v55 = vpop.f32.mrb[4].mxu0 }
 0x14e   : > { %v678_v56 = vpop.f32.mrb[5].mxu0  ;;  %v2335_v63 = vsel %vm802_vm9, %v1852_v55, %v2306_v43  ;;  %v563_v55 = vld [vmem:[%s2242_s6 + $0x40] sm:$0xff] }
 0x14f   : > { %v1853_v57 = vpop.f32.mrb[6].mxu0  ;;  %v2328_v59 = vsel %vm800_vm7, %v678_v56, %v2306_v43  ;;  %v564_v56 = vld [vmem:[%s2242_s6 + $0x48] sm:$0xff] }
 0x150   : > { %850 = vmax.xlane.f32.xlu0 %v2325_v58  ;;  %852 = vmax.xlane.f32.xlu1 %v2328_v59  ;;  %v681_v60 = vpop.f32.mrb[7].mxu0  ;;  %v2345_v5 = vsel %vm803_vm10, %v1853_v57, %v2306_v43  ;;  %v575_v57 = vpack.c.bf16 %v564_v56, %v563_v55 }
 0x151   : > { %v2338_v0 = vsel %vm801_vm8, %v681_v60, %v2306_v43 }
 0x154   : > { %856 = vmax.xlane.f32.xlu1 %v2335_v63  ;;  %854 = vmax.xlane.f32.xlu0 %v2338_v0 }
 0x155   : > { %v1856_v1 = vpop.f32.mrb[8].mxu0 }
 0x156   : > { %v694_v2 = vpop.f32.mrb[9].mxu0  ;;  %v2355_v9 = vsel %vm806_vm13, %v1856_v1, %v2306_v43 }
 0x157   : > { %v1857_v4 = vpop.f32.mrb[10].mxu0  ;;  %v2348_v6 = vsel %vm804_vm11, %v694_v2, %v2306_v43  ;;  %v2447_v2 = vld [vmem:[#allocation2 + $0x38] sm:$0xff] }
 0x158   : > { %858 = vmax.xlane.f32.xlu0 %v2345_v5  ;;  %860 = vmax.xlane.f32.xlu1 %v2348_v6  ;;  %v697_v7 = vpop.f32.mrb[11].mxu0  ;;  %v2365_v16 = vsel %vm807_vm14, %v1857_v4, %v2306_v43  ;;  %v565_v4 = vld [vmem:[%s2242_s6 + $0x50] sm:$0xff] }
 0x159   : > { %v2358_v10 = vsel %vm805_vm12, %v697_v7, %v2306_v43  ;;  %v566_v7 = vld [vmem:[%s2242_s6 + $0x58] sm:$0xff] }
 0x15a   : > { %v576_v8 = vpack.c.bf16 %v566_v7, %v565_v4  ;;  %v2516_v7 = vld [vmem:[#allocation2 + $0x78] sm:$0xff] }
 0x15c   : > { %864 = vmax.xlane.f32.xlu1 %v2355_v9  ;;  %862 = vmax.xlane.f32.xlu0 %v2358_v10 }
 0x15d   : > { %v1860_v12 = vpop.f32.mrb[12].mxu0 }
 0x15e   : > { %v710_v13 = vpop.f32.mrb[13].mxu0  ;;  %v2375_v20 = vsel %vm810_vm3, %v1860_v12, %v2306_v43 }
 0x15f   : > { %v1861_v15 = vpop.f32.mrb[14].mxu0  ;;  %v2368_v17 = vsel %vm808_vm15, %v710_v13, %v2306_v43 }
 0x160   : > { %866 = vmax.xlane.f32.xlu0 %v2365_v16  ;;  %868 = vmax.xlane.f32.xlu1 %v2368_v17  ;;  %v713_v18 = vpop.f32.mrb[15].mxu0  ;;  %v2384_v22 = vsel %vm811_vm4, %v1861_v15, %v2306_v43 }
 0x161   : > { %v2378_v21 = vsel %vm809_vm2, %v713_v18, %v2306_v43  ;;  %v561_v43 = vld [vmem:[%s2242_s6 + $0x30] sm:$0xff] }
 0x162   : > { %v574_v45 = vpack.c.bf16 %v562_v44, %v561_v43  ;;  %v2467_v18 = vld [vmem:[#allocation2 + $0x50] sm:$0xff] }
 0x164   : > { %872 = vmax.xlane.f32.xlu1 %v2375_v20  ;;  %870 = vmax.xlane.f32.xlu0 %v2378_v21 }
 0x165   : > { %1868 = vmatprep.subr.bf16.mxu1 %v574_v45 }
 0x166   : > { %1869 = vmatpush3.bf16.msra.mxu1 %v574_v45 }
 0x167   : > { %1870 = vmatprep.subr.bf16.mxu1 %v575_v57 }
 0x168   : > { %874 = vmax.xlane.f32.xlu0 %v2384_v22 }
 0x16a   : > { %1871 = vmatpush3.bf16.msra.mxu1 %v575_v57 }
 0x16b   : > { %1872 = vmatprep.subr.bf16.mxu1 %v576_v8 }
 0x16e   : > { %1873 = vmatpush3.bf16.msra.mxu1 %v576_v8 }
 0x16f   : > { %1874 = vmatprep.subr.bf16.mxu1 %v577_v26 }
 0x172   : > { %1875 = vmatpush3.bf16.msra.mxu1 %v577_v26 }
 0x1d5   : > { %v845_v30 = vpop.xlane.xlu0 %844 }
 0x1d6   : > { %v2396_v32 = vmax.f32 %v2391_v29, %v845_v30 }
 0x1d7   : > { %v847_v33 = vpop.xlane.xlu1 %846 }
 0x1d8   : > { %1414 = vst.msk [vmem:[#allocation2] sm:$0xff] %vm420_vm0, %v2396_v32  ;;  %v2405_v37 = vmax.f32 %v2393_v31, %v847_v33  ;;  %942 = vperm.xlu1 %1933, %v2396_v32   ;;  %v892_v25 = vsub.f32 %v2391_v29, %v2396_v32  ;;  %v2487_v33 = vld [vmem:[#allocation2 + $0x58] sm:$0xff] }
 0x1d9   : > { %v849_v39 = vpop.xlane.xlu0 %848 }
 0x1da   : > { %1415 = vst.msk [vmem:[#allocation2 + $0x8] sm:$0xff] %vm420_vm0, %v2405_v37  ;;  %v2411_v40 = vmax.f32 %v2398_v34, %v849_v39  ;;  %947 = vperm.xlu0 %1932, %v2405_v37   ;;  %v893_v11 = vsub.f32 %v2393_v31, %v2405_v37  ;;  %v570_v37 = vld [vmem:[%s2242_s6 + $0x78] sm:$0xff]  ;;  %v908_v38 = vmul.f32 1.442695, %v892_v25 }
 0x1dc   : > { %1416 = vst.msk [vmem:[#allocation2 + $0x10] sm:$0xff] %vm420_vm0, %v2411_v40  ;;  %952 = vperm.xlu1 %1933, %v2411_v40   ;;  %v910_v27 = vmul.f32 1.442695, %v893_v11  ;;  %v894_v39 = vsub.f32 %v2398_v34, %v2411_v40  ;;  %v2503_v40 = vld [vmem:[#allocation2 + $0x70] sm:$0xff] }
 0x1dd   : > { %v851_v46 = vpop.xlane.xlu0 %850  ;;  %v853_v47 = vpop.xlane.xlu1 %852 }
 0x1de   : > { %v2424_v48 = vmax.f32 %v2414_v41, %v851_v46  ;;  %v2427_v50 = vmax.f32 %v2416_v42, %v853_v47  ;;  %1934 = vpow2.f32 %v910_v27  ;;  %v912_v55 = vmul.f32 1.442695, %v894_v39 }
 0x1df   : > { %1936 = vpow2.f32 %v908_v38 }
 0x1e0   : > { %1417 = vst.msk [vmem:[#allocation2 + $0x18] sm:$0xff] %vm420_vm0, %v2424_v48  ;;  %1418 = vst.msk [vmem:[#allocation2 + $0x20] sm:$0xff] %vm420_vm0, %v2427_v50  ;;  %957 = vperm.xlu1 %1933, %v2424_v48   ;;  %962 = vperm.xlu0 %1932, %v2427_v50   ;;  %v896_v28 = vsub.f32 %v2416_v42, %v2427_v50  ;;  %v578_v42 = vpack.c.bf16 %v570_v37, %v569_v36  ;;  %v2505_v50 = vld [vmem:[#allocation2 + $0x68] sm:$0xff] }
 0x1e1   : > { %v857_v60 = vpop.xlane.xlu1 %856  ;;  %v855_v61 = vpop.xlane.xlu0 %854  ;;  %v895_v56 = vsub.f32 %v2414_v41, %v2424_v48 }
 0x1e2   : > { %v2442_v62 = vmax.f32 %v2429_v52, %v857_v60  ;;  %v2445_v1 = vmax.f32 %v2431_v54, %v855_v61  ;;  %v916_v43 = vmul.f32 1.442695, %v896_v28  ;;  %1876 = vmatprep.subr.bf16.mxu1 %v578_v42 }
 0x1e3   : > { %1877 = vmatpush3.bf16.msra.mxu1 %v578_v42  ;;  %v914_v41 = vmul.f32 1.442695, %v895_v56 }
 0x1e4   : > { %1420 = vst.msk [vmem:[#allocation2 + $0x30] sm:$0xff] %vm420_vm0, %v2442_v62  ;;  %1419 = vst.msk [vmem:[#allocation2 + $0x28] sm:$0xff] %vm420_vm0, %v2445_v1  ;;  %967 = vperm.xlu1 %1933, %v2445_v1   ;;  %972 = vperm.xlu0 %1932, %v2442_v62   ;;  %v898_v44 = vsub.f32 %v2429_v52, %v2442_v62  ;;  %1938 = vpow2.f32 %v916_v43  ;;  %v897_v48 = vsub.f32 %v2431_v54, %v2445_v1 }
 0x1e5   : > { %v859_v12 = vpop.xlane.xlu0 %858  ;;  %v861_v13 = vpop.xlane.xlu1 %860  ;;  %1940 = vpow2.f32 %v912_v55 }
 0x1e6   : > { %v2462_v14 = vmax.f32 %v2447_v2, %v859_v12  ;;  %v2465_v15 = vmax.f32 %v2449_v3, %v861_v13  ;;  %v920_v52 = vmul.f32 1.442695, %v898_v44  ;;  %v918_v1 = vmul.f32 1.442695, %v897_v48 }
 0x1e8   : > { %1421 = vst.msk [vmem:[#allocation2 + $0x38] sm:$0xff] %vm420_vm0, %v2462_v14  ;;  %1422 = vst.msk [vmem:[#allocation2 + $0x40] sm:$0xff] %vm420_vm0, %v2465_v15  ;;  %977 = vperm.xlu1 %1933, %v2462_v14   ;;  %982 = vperm.xlu0 %1932, %v2465_v15   ;;  %1942 = vpow2.f32 %v920_v52  ;;  %v900_v11 = vsub.f32 %v2449_v3, %v2465_v15  ;;  %v2531_v54 = vpop.eup %1934  ;;  %v899_v23 = vsub.f32 %v2447_v2, %v2462_v14 }
 0x1e9   : > { %v865_v30 = vpop.xlane.xlu1 %864  ;;  %v863_v31 = vpop.xlane.xlu0 %862  ;;  %1944 = vpow2.f32 %v914_v41 }
 0x1ea   : > { %v886_v29 = vmax.f32 %v2467_v18, %v865_v30  ;;  %v2485_v32 = vmax.f32 %v2469_v19, %v863_v31  ;;  %v924_v3 = vmul.f32 1.442695, %v900_v11  ;;  %v2542_v25 = vpop.eup %1936  ;;  %v922_v2 = vmul.f32 1.442695, %v899_v23 }
 0x1ec   : > { %1424 = vst.msk [vmem:[#allocation2 + $0x50] sm:$0xff] %vm420_vm0, %v886_v29  ;;  %1423 = vst.msk [vmem:[#allocation2 + $0x48] sm:$0xff] %vm420_vm0, %v2485_v32  ;;  %987 = vperm.xlu1 %1933, %v2485_v32   ;;  %992 = vperm.xlu0 %1932, %v886_v29   ;;  %v902_v57 = vsub.f32 %v2467_v18, %v886_v29  ;;  %v901_v31 = vsub.f32 %v2469_v19, %v2485_v32 }
 0x1ed   : > { %v867_v45 = vpop.xlane.xlu0 %866  ;;  %v869_v46 = vpop.xlane.xlu1 %868 }
 0x1ee   : > { %v887_v47 = vmax.f32 %v2487_v33, %v867_v45  ;;  %v888_v34 = vmax.f32 %v2489_v35, %v869_v46  ;;  %v928_v12 = vmul.f32 1.442695, %v902_v57  ;;  %v2544_v26 = vpop.eup %1938 }
 0x1ef   : > { %v2549_v28 = vpop.eup %1940 }
 0x1f0   : > { %1425 = vst.msk [vmem:[#allocation2 + $0x58] sm:$0xff] %vm420_vm0, %v887_v47  ;;  %1426 = vst.msk [vmem:[#allocation2 + $0x60] sm:$0xff] %vm420_vm0, %v888_v34  ;;  %997 = vperm.xlu1 %1933, %v887_v47   ;;  %1002 = vperm.xlu0 %1932, %v888_v34   ;;  %1946 = vpow2.f32 %v928_v12  ;;  %v904_v15 = vsub.f32 %v2489_v35, %v888_v34  ;;  %v903_v14 = vsub.f32 %v2487_v33, %v887_v47 }
 0x1f1   : > { %v873_v60 = vpop.xlane.xlu1 %872  ;;  %v871_v61 = vpop.xlane.xlu0 %870  ;;  %1948 = vpow2.f32 %v918_v1  ;;  %v926_v33 = vmul.f32 1.442695, %v901_v31 }
 0x1f2   : > { %v2513_v62 = vmax.f32 %v2503_v40, %v873_v60  ;;  %v889_v4 = vmax.f32 %v2505_v50, %v871_v61  ;;  %1950 = vpow2.f32 %v924_v3  ;;  %v932_v27 = vmul.f32 1.442695, %v904_v15  ;;  %v2551_v30 = vpop.eup %1942 }
 0x1f3   : > { %1952 = vpow2.f32 %v922_v2  ;;  %v930_v29 = vmul.f32 1.442695, %v903_v14  ;;  %v2557_v35 = vpop.eup %1944 }
 0x1f4   : > { %v906_v8 = vsub.f32 %v2503_v40, %v2513_v62  ;;  %1428 = vst.msk [vmem:[#allocation2 + $0x70] sm:$0xff] %vm420_vm0, %v2513_v62  ;;  %1427 = vst.msk [vmem:[#allocation2 + $0x68] sm:$0xff] %vm420_vm0, %v889_v4  ;;  %1012 = vperm.xlu0 %1932, %v2513_v62   ;;  %1007 = vperm.xlu1 %1933, %v889_v4   ;;  %1954 = vpow2.f32 %v932_v27  ;;  %v905_v37 = vsub.f32 %v2505_v50, %v889_v4 }
 0x1f5   : > { %v875_v13 = vpop.xlane.xlu0 %874  ;;  %1956 = vpow2.f32 %v930_v29 }
 0x1f6   : > { %v2529_v18 = vmax.f32 %v2516_v7, %v875_v13  ;;  %1958 = vpow2.f32 %v926_v33  ;;  %v934_v19 = vmul.f32 1.442695, %v905_v37 }
 0x1f8   : > { %v907_v24 = vsub.f32 %v2516_v7, %v2529_v18  ;;  %1429 = vst.msk [vmem:[#allocation2 + $0x78] sm:$0xff] %vm420_vm0, %v2529_v18  ;;  %1188 = vperm.xlu0 %1932, %v2531_v54   ;;  %1017 = vperm.xlu1 %1933, %v2529_v18   ;;  %1960 = vpow2.f32 %v934_v19 }
 0x1fa   : > { %v2559_v36 = vpop.eup %1946 }
 0x1fb   : > { %v2564_v38 = vpop.eup %1948 }
 0x1fc   : > { %1203 = vperm.xlu0 %1932, %v2544_v26   ;;  %1183 = vperm.xlu1 %1933, %v2542_v25   ;;  %v2566_v39 = vpop.eup %1950 }
 0x1fd   : > { %v2570_v32 = vpop.eup %1952 }
 0x1fe   : > { %v2572_v42 = vpop.eup %1954 }
 0x1ff   : > { %v2576_v43 = vpop.eup %1956 }
 0x200   : > { %1213 = vperm.xlu0 %1932, %v2551_v30   ;;  %1193 = vperm.xlu1 %1933, %v2549_v28   ;;  %v2579_v44 = vpop.eup %1958 }
 0x202   : > { %v2582_v45 = vpop.eup %1960 }
 0x204   : > { %1233 = vperm.xlu0 %1932, %v2559_v36   ;;  %1198 = vperm.xlu1 %1933, %v2557_v35  }
 0x208   : > { %1223 = vperm.xlu0 %1932, %v2566_v39   ;;  %1208 = vperm.xlu1 %1933, %v2564_v38  }
 0x20c   : > { %1243 = vperm.xlu0 %1932, %v2572_v42   ;;  %1218 = vperm.xlu1 %1933, %v2570_v32  }
 0x210   : > { %1238 = vperm.xlu1 %1933, %v2576_v43  }
 0x214   : > { %1228 = vperm.xlu1 %1933, %v2579_v44  }
 0x218   : > { %1248 = vperm.xlu1 %1933, %v2582_v45  }
 0x257   : > { %v943_v46 = vpop.permute.xlu1 %942 }
 0x258   : > { %v1020_v47 = vsub.f32 %v2309_v49, %v943_v46 }
 0x259   : > { %v948_v34 = vpop.permute.xlu0 %947 }
 0x25a   : > { %v1036_v50 = vmul.f32 1.442695, %v1020_v47  ;;  %v1021_v55 = vsub.f32 %v2315_v51, %v948_v34 }
 0x25b   : > { %v953_v56 = vpop.permute.xlu1 %952 }
 0x25c   : > { %v1038_v52 = vmul.f32 1.442695, %v1021_v55  ;;  %v1022_v57 = vsub.f32 %v2319_v53, %v953_v56  ;;  %1962 = vpow2.f32 %v1036_v50 }
 0x25e   : > { %1964 = vpow2.f32 %v1038_v52  ;;  %v1040_v60 = vmul.f32 1.442695, %v1022_v57 }
 0x25f   : > { %v958_v61 = vpop.permute.xlu1 %957  ;;  %v963_v4 = vpop.permute.xlu0 %962 }
 0x260   : > { %1966 = vpow2.f32 %v1040_v60  ;;  %v1023_v41 = vsub.f32 %v2325_v58, %v958_v61  ;;  %v1024_v48 = vsub.f32 %v2328_v59, %v963_v4 }
 0x262   : > { %v1042_v11 = vmul.f32 1.442695, %v1023_v41  ;;  %v1044_v49 = vmul.f32 1.442695, %v1024_v48 }
 0x263   : > { %v968_v12 = vpop.permute.xlu1 %967  ;;  %v973_v13 = vpop.permute.xlu0 %972 }
 0x264   : > { %1968 = vpow2.f32 %v1042_v11  ;;  %v1025_v51 = vsub.f32 %v2338_v0, %v968_v12  ;;  %v1026_v1 = vsub.f32 %v2335_v63, %v973_v13 }
 0x265   : > { %1970 = vpow2.f32 %v1044_v49 }
 0x266   : > { %v1046_v53 = vmul.f32 1.442695, %v1025_v51  ;;  %v1048_v23 = vmul.f32 1.442695, %v1026_v1  ;;  %v1963_v3 = vpop.eup %1962 }
 0x267   : > { %v978_v15 = vpop.permute.xlu1 %977  ;;  %v983_v2 = vpop.permute.xlu0 %982 }
 0x268   : > { %v1965_v14 = vpop.eup %1964  ;;  %1972 = vpow2.f32 %v1046_v53  ;;  %v1027_v58 = vsub.f32 %v2345_v5, %v978_v15  ;;  %v1028_v59 = vsub.f32 %v2348_v6, %v983_v2 }
 0x269   : > { %1974 = vpow2.f32 %v1048_v23  ;;  %1102 = vadd.xlane.f32.xlu1 %v1965_v14  ;;  %v1277_v27 = vpack.c.bf16 %v1965_v14, %v1963_v3 }
 0x26a   : > { %v1967_v31 = vpop.eup %1966  ;;  %v1050_v29 = vmul.f32 1.442695, %v1027_v58  ;;  %v1052_v0 = vmul.f32 1.442695, %v1028_v59 }
 0x26b   : > { %v988_v33 = vpop.permute.xlu1 %987  ;;  %1104 = vadd.xlane.f32.xlu0 %v1967_v31  ;;  %1878 = vmatprep.mubr.bf16.mxu1 %v1277_v27  ;;  %v993_v63 = vpop.permute.xlu0 %992 }
 0x26c   : > { %1976 = vpow2.f32 %v1050_v29  ;;  %v1029_v37 = vsub.f32 %v2358_v10, %v988_v33  ;;  %v1030_v19 = vsub.f32 %v2355_v9, %v993_v63  ;;  %v936_v29 = vmul.f32 1.442695, %v906_v8 }
 0x26d   : > { %1978 = vpow2.f32 %v1052_v0 }
 0x26e   : > { %v1969_v46 = vpop.eup %1968  ;;  %v1054_v47 = vmul.f32 1.442695, %v1029_v37  ;;  %v1056_v5 = vmul.f32 1.442695, %v1030_v19 }
 0x26f   : > { %v998_v6 = vpop.permute.xlu1 %997  ;;  %1100 = vadd.xlane.f32.xlu0 %v1963_v3  ;;  %v1003_v34 = vpop.permute.xlu0 %1002  ;;  %v1278_v50 = vpack.c.bf16 %v1969_v46, %v1967_v31  ;;  %v938_v31 = vmul.f32 1.442695, %v907_v24 }
 0x270   : > { %1980 = vpow2.f32 %v1054_v47  ;;  %v1031_v55 = vsub.f32 %v2365_v16, %v998_v6  ;;  %v1032_v56 = vsub.f32 %v2368_v17, %v1003_v34  ;;  %v1971_v52 = vpop.eup %1970  ;;  %v1069_v34 = vld [vmem:[#allocation3 + $0x8] sm:$0xff] }
 0x271   : > { %1982 = vpow2.f32 %v1056_v5  ;;  %1879 = vmatmul.mubr.bf16.vlgmr.msra.gmra.mrb[0].mxu1 %v1278_v50 }
 0x272   : > { %v1973_v57 = vpop.eup %1972  ;;  %v1058_v10 = vmul.f32 1.442695, %v1031_v55  ;;  %v1060_v9 = vmul.f32 1.442695, %v1032_v56  ;;  %v1070_v55 = vld [vmem:[#allocation3 + $0x10] sm:$0xff]  ;;  %v1085_v56 = vmul.f32 %v2531_v54, %v1069_v34 }
 0x273   : > { %v1975_v60 = vpop.eup %1974  ;;  %1106 = vadd.xlane.f32.xlu0 %v1969_v46  ;;  %v1008_v61 = vpop.permute.xlu1 %1007  ;;  %v1279_v41 = vpack.c.bf16 %v1973_v57, %v1971_v52 }
 0x274   : > { %v1013_v4 = vpop.permute.xlu0 %1012  ;;  %1984 = vpow2.f32 %v1058_v10  ;;  %v1033_v48 = vsub.f32 %v2378_v21, %v1008_v61  ;;  %1112 = vadd.xlane.f32.xlu1 %v1975_v60  ;;  %v1086_v10 = vmul.f32 %v2549_v28, %v1070_v55 }
 0x275   : > { %v1034_v11 = vsub.f32 %v2375_v20, %v1013_v4  ;;  %1882 = vmatprep.mubr.bf16.mxu1 %v1279_v41  ;;  %1986 = vpow2.f32 %v1060_v9  ;;  %v1068_v9 = vld [vmem:[#allocation3] sm:$0xff] }
 0x276   : > { %v1977_v16 = vpop.eup %1976  ;;  %v1062_v17 = vmul.f32 1.442695, %v1033_v48  ;;  %v1084_v4 = vmul.f32 %v2542_v25, %v1068_v9  ;;  %v1071_v48 = vld [vmem:[#allocation3 + $0x18] sm:$0xff] }
 0x277   : > { %v1064_v49 = vmul.f32 1.442695, %v1034_v11  ;;  %1114 = vadd.xlane.f32.xlu0 %v1977_v16  ;;  %v1018_v12 = vpop.permute.xlu1 %1017  ;;  %v1280_v13 = vpack.c.bf16 %v1977_v16, %v1975_v60  ;;  %v1979_v1 = vpop.eup %1978  ;;  %v1074_v16 = vld [vmem:[#allocation3 + $0x30] sm:$0xff]  ;;  %v1087_v54 = vmul.f32 %v2557_v35, %v1071_v48 }
 0x278   : > { %1988 = vpow2.f32 %v1062_v17  ;;  %v1035_v51 = vsub.f32 %v2384_v22, %v1018_v12  ;;  %1108 = vadd.xlane.f32.xlu1 %v1971_v52  ;;  %v2619_v18 = vpop.permute.xlu0 %1188  ;;  %v1090_v17 = vmul.f32 %v2551_v30, %v1074_v16 }
 0x279   : > { %1990 = vpow2.f32 %v1064_v49  ;;  %1883 = vmatmul.mubr.bf16.gmra.mrb[4].mxu1 %v1280_v13  ;;  %v1075_v49 = vld [vmem:[#allocation3 + $0x38] sm:$0xff] }
 0x27a   : > { %v1981_v53 = vpop.eup %1980  ;;  %v1066_v21 = vmul.f32 1.442695, %v1035_v51  ;;  %v1072_v51 = vld [vmem:[#allocation3 + $0x20] sm:$0xff]  ;;  %v1091_v25 = vmul.f32 %v2570_v32, %v1075_v49  ;;  %v1079_v32 = vld [vmem:[#allocation3 + $0x58] sm:$0xff] }
 0x27b   : > { %v1983_v23 = vpop.eup %1982  ;;  %1110 = vadd.xlane.f32.xlu0 %v1973_v57  ;;  %v1281_v20 = vpack.c.bf16 %v1981_v53, %v1979_v1  ;;  %v2613_v63 = vpop.permute.xlu1 %1183  ;;  %v1165_v49 = vld [vmem:[#allocation4] sm:$0xff] }
 0x27c   : > { %1992 = vpow2.f32 %v1066_v21  ;;  %1120 = vadd.xlane.f32.xlu1 %v1983_v23  ;;  %v2623_v40 = vpop.permute.xlu0 %1203 }
 0x27d   : > { %1886 = vmatprep.mubr.bf16.mxu1 %v1281_v20  ;;  %1994 = vpow2.f32 %v938_v31 }
 0x27e   : > { %v1985_v3 = vpop.eup %1984  ;;  %1996 = vpow2.f32 %v936_v29 }
 0x27f   : > { %1122 = vadd.xlane.f32.xlu0 %v1985_v3  ;;  %v1282_v15 = vpack.c.bf16 %v1985_v3, %v1983_v23  ;;  %v1987_v2 = vpop.eup %1986  ;;  %v2615_v37 = vpop.permute.xlu1 %1193  ;;  %v1073_v23 = vld [vmem:[#allocation3 + $0x28] sm:$0xff]  ;;  %v1078_v3 = vld [vmem:[#allocation3 + $0x50] sm:$0xff] }
 0x280   : > { %1116 = vadd.xlane.f32.xlu1 %v1979_v1  ;;  %v2627_v8 = vpop.permute.xlu0 %1213 }
 0x281   : > { %1887 = vmatmul.mubr.bf16.gmra.mrb[8].mxu1 %v1282_v15  ;;  %v1089_v15 = vmul.f32 %v2564_v38, %v1073_v23  ;;  %v1077_v38 = vld [vmem:[#allocation3 + $0x48] sm:$0xff] }
 0x282   : > { %v1989_v14 = vpop.eup %1988 }
 0x283   : > { %v1991_v22 = vpop.eup %1990  ;;  %1118 = vadd.xlane.f32.xlu0 %v1981_v53  ;;  %v1283_v58 = vpack.c.bf16 %v1989_v14, %v1987_v2  ;;  %v2617_v7 = vpop.permute.xlu1 %1198  ;;  %v1088_v53 = vmul.f32 %v2544_v26, %v1072_v51  ;;  %v1261_v51 = vmul.f32 %v2613_v63, %v1165_v49  ;;  %v1172_v63 = vld [vmem:[#allocation4 + $0x38] sm:$0xff] }
 0x284   : > { %1128 = vadd.xlane.f32.xlu1 %v1991_v22  ;;  %v2631_v46 = vpop.permute.xlu0 %1233 }
 0x285   : > { %1890 = vmatprep.mubr.bf16.mxu1 %v1283_v58 }
 0x286   : > { %v1993_v59 = vpop.eup %1992 }
 0x287   : > { %1130 = vadd.xlane.f32.xlu0 %v1993_v59  ;;  %v1284_v27 = vpack.c.bf16 %v1993_v59, %v1991_v22  ;;  %v2607_v0 = vpop.eup %1994  ;;  %v2621_v24 = vpop.permute.xlu1 %1208  ;;  %v1076_v59 = vld [vmem:[#allocation3 + $0x40] sm:$0xff] }
 0x288   : > { %1124 = vadd.xlane.f32.xlu1 %v1987_v2  ;;  %v2610_v33 = vpop.eup %1996  ;;  %v2635_v5 = vpop.permute.xlu0 %1223  ;;  %v1094_v2 = vmul.f32 %v2559_v36, %v1078_v3  ;;  %v1092_v31 = vmul.f32 %v2566_v39, %v1076_v59 }
 0x289   : > { %1891 = vmatmul.mubr.bf16.gmra.mrb[12].mxu1 %v1284_v27  ;;  %v1095_v27 = vmul.f32 %v2576_v43, %v1079_v32  ;;  %v1083_v43 = vld [vmem:[#allocation3 + $0x78] sm:$0xff] }
 0x28b   : > { %1126 = vadd.xlane.f32.xlu0 %v1989_v14  ;;  %v2625_v62 = vpop.permute.xlu1 %1218 }
 0x28c   : > { %v2639_v50 = vpop.permute.xlu0 %1243  ;;  %v1268_v32 = vmul.f32 %v2625_v62, %v1172_v63 }
 0x28f   : > { %v2629_v19 = vpop.permute.xlu1 %1238 }
 0x293   : > { %v2633_v47 = vpop.permute.xlu1 %1228 }
 0x297   : > { %v2637_v6 = vpop.permute.xlu1 %1248 }
 0x299   : > { %1258 = vperm.xlu1 %1933, %v2607_v0  }
 0x2a1   : > { %1253 = vperm.xlu0 %1932, %v2610_v33  }
 0x2f6   : > { %v1103_v52 = vpop.xlane.xlu1 %1102 }
 0x2f7   : > { %v1133_v57 = vadd.f32 %v1103_v52, %v1085_v56  ;;  %v1082_v56 = vld [vmem:[#allocation3 + $0x70] sm:$0xff]  ;;  %v1093_v52 = vmul.f32 %v2579_v44, %v1077_v38  ;;  %v1081_v44 = vld [vmem:[#allocation3 + $0x68] sm:$0xff] }
 0x2f8   : > { %v1105_v60 = vpop.xlane.xlu0 %1104  ;;  %v1175_v38 = vld [vmem:[#allocation4 + $0x50] sm:$0xff] }
 0x2f9   : > { %1150 = vst.msk [vmem:[#allocation3 + $0x8] sm:$0xff] %vm420_vm0, %v1133_v57  ;;  %v1134_v61 = vadd.f32 %v1105_v60, %v1086_v10  ;;  %v1098_v57 = vmul.f32 %v2610_v33, %v1082_v56  ;;  %v1097_v33 = vmul.f32 %v2582_v45, %v1081_v44  ;;  %v1271_v62 = vmul.f32 %v2631_v46, %v1175_v38 }
 0x2fb   : > { %1151 = vst.msk [vmem:[#allocation3 + $0x10] sm:$0xff] %vm420_vm0, %v1134_v61  ;;  %v1080_v61 = vld [vmem:[#allocation3 + $0x60] sm:$0xff] }
 0x2fc   : > { %v1101_v41 = vpop.xlane.xlu0 %1100 }
 0x2fd   : > { %v1132_v11 = vadd.f32 %v1101_v41, %v1084_v4  ;;  %v1099_v4 = vmul.f32 %v2607_v0, %v1083_v43  ;;  %v1096_v41 = vmul.f32 %v2572_v42, %v1080_v61  ;;  %v1167_v0 = vld [vmem:[#allocation4 + $0x10] sm:$0xff] }
 0x2fe   : > { %v1263_v42 = vmul.f32 %v2615_v37, %v1167_v0  ;;  %v1169_v37 = vld [vmem:[#allocation4 + $0x20] sm:$0xff] }
 0x2ff   : > { %1149 = vst.msk [vmem:[#allocation3] sm:$0xff] %vm420_vm0, %v1132_v11 }
 0x300   : > { %v1107_v28 = vpop.xlane.xlu0 %1106 }
 0x301   : > { %v1113_v12 = vpop.xlane.xlu1 %1112  ;;  %v1135_v13 = vadd.f32 %v1107_v28, %v1087_v54 }
 0x302   : > { %v1138_v1 = vadd.f32 %v1113_v12, %v1090_v17  ;;  %v1168_v12 = vld [vmem:[#allocation4 + $0x18] sm:$0xff] }
 0x303   : > { %1152 = vst.msk [vmem:[#allocation3 + $0x18] sm:$0xff] %vm420_vm0, %v1135_v13  ;;  %v1166_v13 = vld [vmem:[#allocation4 + $0x8] sm:$0xff] }
 0x304   : > { %1155 = vst.msk [vmem:[#allocation3 + $0x30] sm:$0xff] %vm420_vm0, %v1138_v1  ;;  %v1115_v21 = vpop.xlane.xlu0 %1114  ;;  %v1262_v45 = vmul.f32 %v2619_v18, %v1166_v13  ;;  %v1265_v18 = vmul.f32 %v2623_v40, %v1169_v37  ;;  %v1176_v40 = vld [vmem:[#allocation4 + $0x58] sm:$0xff] }
 0x305   : > { %v1109_v20 = vpop.xlane.xlu1 %1108  ;;  %v1139_v35 = vadd.f32 %v1115_v21, %v1091_v25  ;;  %v1264_v25 = vmul.f32 %v2617_v7, %v1168_v12 }
 0x306   : > { %v1136_v30 = vadd.f32 %v1109_v20, %v1088_v53 }
 0x307   : > { %1156 = vst.msk [vmem:[#allocation3 + $0x38] sm:$0xff] %vm420_vm0, %v1139_v35 }
 0x308   : > { %1153 = vst.msk [vmem:[#allocation3 + $0x20] sm:$0xff] %vm420_vm0, %v1136_v30  ;;  %v1111_v14 = vpop.xlane.xlu0 %1110  ;;  %v1171_v30 = vld [vmem:[#allocation4 + $0x30] sm:$0xff] }
 0x309   : > { %v1121_v22 = vpop.xlane.xlu1 %1120  ;;  %v1137_v58 = vadd.f32 %v1111_v14, %v1089_v15  ;;  %v1267_v7 = vmul.f32 %v2627_v8, %v1171_v30 }
 0x30a   : > { %v1142_v26 = vadd.f32 %v1121_v22, %v1094_v2  ;;  %v1170_v2 = vld [vmem:[#allocation4 + $0x28] sm:$0xff] }
 0x30b   : > { %1154 = vst.msk [vmem:[#allocation3 + $0x28] sm:$0xff] %vm420_vm0, %v1137_v58  ;;  %v1266_v59 = vmul.f32 %v2621_v24, %v1170_v2 }
 0x30c   : > { %1159 = vst.msk [vmem:[#allocation3 + $0x50] sm:$0xff] %vm420_vm0, %v1142_v26  ;;  %v1123_v29 = vpop.xlane.xlu0 %1122 }
 0x30d   : > { %v1117_v34 = vpop.xlane.xlu1 %1116  ;;  %v1143_v55 = vadd.f32 %v1123_v29, %v1095_v27 }
 0x30e   : > { %v1140_v36 = vadd.f32 %v1117_v34, %v1092_v31  ;;  %v1173_v34 = vld [vmem:[#allocation4 + $0x40] sm:$0xff] }
 0x30f   : > { %1160 = vst.msk [vmem:[#allocation3 + $0x58] sm:$0xff] %vm420_vm0, %v1143_v55  ;;  %v1174_v55 = vld [vmem:[#allocation4 + $0x48] sm:$0xff]  ;;  %v1269_v24 = vmul.f32 %v2635_v5, %v1173_v34  ;;  %v1180_v5 = vld [vmem:[#allocation4 + $0x78] sm:$0xff] }
 0x310   : > { %1157 = vst.msk [vmem:[#allocation3 + $0x40] sm:$0xff] %vm420_vm0, %v1140_v36  ;;  %v1119_v10 = vpop.xlane.xlu0 %1118  ;;  %v1272_v36 = vmul.f32 %v2629_v19, %v1176_v40 }
 0x311   : > { %v1129_v60 = vpop.xlane.xlu1 %1128  ;;  %v1141_v9 = vadd.f32 %v1119_v10, %v1093_v52  ;;  %v1270_v10 = vmul.f32 %v2633_v47, %v1174_v55 }
 0x312   : > { %v1146_v39 = vadd.f32 %v1129_v60, %v1098_v57 }
 0x313   : > { %1158 = vst.msk [vmem:[#allocation3 + $0x48] sm:$0xff] %vm420_vm0, %v1141_v9 }
 0x314   : > { %1163 = vst.msk [vmem:[#allocation3 + $0x70] sm:$0xff] %vm420_vm0, %v1146_v39  ;;  %v1131_v48 = vpop.xlane.xlu0 %1130  ;;  %v1179_v39 = vld [vmem:[#allocation4 + $0x70] sm:$0xff] }
 0x315   : > { %v1125_v11 = vpop.xlane.xlu1 %1124  ;;  %v1147_v16 = vadd.f32 %v1131_v48, %v1099_v4  ;;  %v1178_v48 = vld [vmem:[#allocation4 + $0x68] sm:$0xff] }
 0x316   : > { %v1144_v54 = vadd.f32 %v1125_v11, %v1096_v41  ;;  %v1177_v41 = vld [vmem:[#allocation4 + $0x60] sm:$0xff] }
 0x317   : > { %1164 = vst.msk [vmem:[#allocation3 + $0x78] sm:$0xff] %vm420_vm0, %v1147_v16  ;;  %v1273_v44 = vmul.f32 %v2639_v50, %v1177_v41 }
 0x318   : > { %1161 = vst.msk [vmem:[#allocation3 + $0x60] sm:$0xff] %vm420_vm0, %v1144_v54  ;;  %v1127_v17 = vpop.xlane.xlu0 %1126 }
 0x319   : > { %v1145_v28 = vadd.f32 %v1127_v17, %v1097_v33  ;;  %v1259_v19 = vpop.permute.xlu1 %1258  ;;  %v1274_v17 = vmul.f32 %v2637_v6, %v1178_v48 }
 0x31a   : > { %v1276_v16 = vmul.f32 %v1259_v19, %v1180_v5 }
 0x31b   : > { %1162 = vst.msk [vmem:[#allocation3 + $0x68] sm:$0xff] %vm420_vm0, %v1145_v28 }
 0x320   : > { %v1254_v4 = vpop.permute.xlu0 %1253 }
 0x321   : > { %v1275_v47 = vmul.f32 %v1254_v4, %v1179_v39 }
 0x344   : > { %v1880_v1 = vpop.f32.mrb[0].mxu1 }
 0x345   : > { %v1384_v53 = vadd.f32 %v1880_v1, %v1263_v42  ;;  %v1319_v21 = vpop.f32.mrb[1].mxu1 }
 0x346   : > { %v1382_v23 = vadd.f32 %v1319_v21, %v1261_v51  ;;  %v1881_v20 = vpop.f32.mrb[2].mxu1 }
 0x347   : > { %1400 = vst.msk [vmem:[#allocation4 + $0x10] sm:$0xff] %vm453_vm1, %v1384_v53  ;;  %v1385_v35 = vadd.f32 %v1881_v20, %v1264_v25  ;;  %v1322_v3 = vpop.f32.mrb[3].mxu1 }
 0x348   : > { %1398 = vst.msk [vmem:[#allocation4] sm:$0xff] %vm453_vm1, %v1382_v23  ;;  %v1383_v15 = vadd.f32 %v1322_v3, %v1262_v45 }
 0x349   : > { %1401 = vst.msk [vmem:[#allocation4 + $0x18] sm:$0xff] %vm453_vm1, %v1385_v35 }
 0x34a   : > { %1399 = vst.msk [vmem:[#allocation4 + $0x8] sm:$0xff] %vm453_vm1, %v1383_v15 }
 0x34c   : > { %v1884_v14 = vpop.f32.mrb[4].mxu1 }
 0x34d   : > { %v1388_v22 = vadd.f32 %v1884_v14, %v1267_v7  ;;  %v1335_v58 = vpop.f32.mrb[5].mxu1 }
 0x34e   : > { %v1386_v26 = vadd.f32 %v1335_v58, %v1265_v18  ;;  %v1885_v27 = vpop.f32.mrb[6].mxu1 }
 0x34f   : > { %1404 = vst.msk [vmem:[#allocation4 + $0x30] sm:$0xff] %vm453_vm1, %v1388_v22  ;;  %v1389_v31 = vadd.f32 %v1885_v27, %v1268_v32  ;;  %v1338_v29 = vpop.f32.mrb[7].mxu1 }
 0x350   : > { %1402 = vst.msk [vmem:[#allocation4 + $0x20] sm:$0xff] %vm453_vm1, %v1386_v26  ;;  %v1387_v8 = vadd.f32 %v1338_v29, %v1266_v59 }
 0x351   : > { %1405 = vst.msk [vmem:[#allocation4 + $0x38] sm:$0xff] %vm453_vm1, %v1389_v31 }
 0x352   : > { %1403 = vst.msk [vmem:[#allocation4 + $0x28] sm:$0xff] %vm453_vm1, %v1387_v8 }
 0x354   : > { %v1888_v56 = vpop.f32.mrb[8].mxu1 }
 0x355   : > { %v1392_v52 = vadd.f32 %v1888_v56, %v1271_v62  ;;  %v1351_v57 = vpop.f32.mrb[9].mxu1 }
 0x356   : > { %v1390_v43 = vadd.f32 %v1351_v57, %v1269_v24  ;;  %v1889_v60 = vpop.f32.mrb[10].mxu1 }
 0x357   : > { %1408 = vst.msk [vmem:[#allocation4 + $0x50] sm:$0xff] %vm453_vm1, %v1392_v52  ;;  %v1393_v9 = vadd.f32 %v1889_v60, %v1272_v36  ;;  %v1354_v61 = vpop.f32.mrb[11].mxu1 }
 0x358   : > { %1406 = vst.msk [vmem:[#allocation4 + $0x40] sm:$0xff] %vm453_vm1, %v1390_v43  ;;  %v1391_v46 = vadd.f32 %v1354_v61, %v1270_v10 }
 0x359   : > { %1409 = vst.msk [vmem:[#allocation4 + $0x58] sm:$0xff] %vm453_vm1, %v1393_v9 }
 0x35a   : > { %1407 = vst.msk [vmem:[#allocation4 + $0x48] sm:$0xff] %vm453_vm1, %v1391_v46 }
 0x35c   : > { %v1892_v11 = vpop.f32.mrb[12].mxu1 }
 0x35d   : > { %v1396_v54 = vadd.f32 %v1892_v11, %v1275_v47  ;;  %v1367_v33 = vpop.f32.mrb[13].mxu1 }
 0x35e   : > { %v1394_v28 = vadd.f32 %v1367_v33, %v1273_v44  ;;  %v1893_v0 = vpop.f32.mrb[14].mxu1 }
 0x35f   : > { %1412 = vst.msk [vmem:[#allocation4 + $0x70] sm:$0xff] %vm453_vm1, %v1396_v54  ;;  %v1397_v49 = vadd.f32 %v1893_v0, %v1276_v16  ;;  %v1370_v12 = vpop.f32.mrb[15].mxu1 }
 0x360   : > { %1410 = vst.msk [vmem:[#allocation4 + $0x60] sm:$0xff] %vm453_vm1, %v1394_v28  ;;  %v1395_v13 = vadd.f32 %v1370_v12, %v1274_v17 }
 0x361   : > { %1413 = vst.msk [vmem:[#allocation4 + $0x78] sm:$0xff] %vm453_vm1, %v1397_v49 }
 0x362   : > { %1411 = vst.msk [vmem:[#allocation4 + $0x68] sm:$0xff] %vm453_vm1, %v1395_v13 }
 0x363 PF: > { %v1435_v50 = vld [vmem:[#allocation3 + $0x10] sm:$0xff]  ;;  %v1433_v42 = vld [vmem:[#allocation3] sm:$0xff]  ;;  %v1436_v51 = vld [vmem:[#allocation3 + $0x18] sm:$0xff]  ;;  %v2075_v1 = vmov 0  }
 0x364   : > { %1999 = vset.pattern.permute.xlu1 %v2075_v1  ;;  %1998 = vset.pattern.permute.xlu0 %v2075_v1  ;;  %2000 = vrcp.f32 %v1435_v50  ;;  %v1434_v6 = vld [vmem:[#allocation3 + $0x8] sm:$0xff]  ;;  %v1437_v53 = vld [vmem:[#allocation3 + $0x20] sm:$0xff]  ;;  %v1440_v21 = vld [vmem:[#allocation3 + $0x38] sm:$0xff] }
 0x365   : > { %2002 = vrcp.f32 %v1433_v42  ;;  %v1438_v25 = vld [vmem:[#allocation3 + $0x28] sm:$0xff]  ;;  %v1439_v45 = vld [vmem:[#allocation3 + $0x30] sm:$0xff]  ;;  %v1441_v30 = vld [vmem:[#allocation3 + $0x40] sm:$0xff] }
 0x366   : > { %2004 = vrcp.f32 %v1436_v51  ;;  %v1442_v35 = vld [vmem:[#allocation3 + $0x48] sm:$0xff]  ;;  %v1444_v37 = vld [vmem:[#allocation3 + $0x58] sm:$0xff]  ;;  %v1443_v7 = vld [vmem:[#allocation3 + $0x50] sm:$0xff] }
 0x367   : > { %2006 = vrcp.f32 %v1434_v6  ;;  %v1446_v18 = vld [vmem:[#allocation3 + $0x68] sm:$0xff]  ;;  %v1445_v32 = vld [vmem:[#allocation3 + $0x60] sm:$0xff]  ;;  %v1448_v58 = vld [vmem:[#allocation3 + $0x78] sm:$0xff] }
 0x368   : > { %2008 = vrcp.f32 %v1438_v25  ;;  %v1447_v26 = vld [vmem:[#allocation3 + $0x70] sm:$0xff]  ;;  %v1481_v55 = vld [vmem:[#allocation4] sm:$0xff]  ;;  %v1484_v57 = vld [vmem:[#allocation4 + $0x18] sm:$0xff] }
 0x369   : > { %2010 = vrcp.f32 %v1437_v53  ;;  %v1483_v62 = vld [vmem:[#allocation4 + $0x10] sm:$0xff]  ;;  %v1482_v10 = vld [vmem:[#allocation4 + $0x8] sm:$0xff]  ;;  %v1485_v4 = vld [vmem:[#allocation4 + $0x20] sm:$0xff] }
 0x36a   : > { %2012 = vrcp.f32 %v1440_v21  ;;  %v1486_v39 = vld [vmem:[#allocation4 + $0x28] sm:$0xff]  ;;  %v1488_v48 = vld [vmem:[#allocation4 + $0x38] sm:$0xff]  ;;  %v1487_v47 = vld [vmem:[#allocation4 + $0x30] sm:$0xff] }
 0x36b   : > { %2014 = vrcp.f32 %v1439_v45  ;;  %v1490_v33 = vld [vmem:[#allocation4 + $0x48] sm:$0xff]  ;;  %v1489_v17 = vld [vmem:[#allocation4 + $0x40] sm:$0xff]  ;;  %v1492_v13 = vld [vmem:[#allocation4 + $0x58] sm:$0xff] }
 0x36c   : > { %2016 = vrcp.f32 %v1442_v35  ;;  %v1491_v50 = vld [vmem:[#allocation4 + $0x50] sm:$0xff]  ;;  %v1494_v25 = vld [vmem:[#allocation4 + $0x68] sm:$0xff]  ;;  %v1493_v53 = vld [vmem:[#allocation4 + $0x60] sm:$0xff] }
 0x36d   : > { %2018 = vrcp.f32 %v1441_v30  ;;  %v1496_v35 = vld [vmem:[#allocation4 + $0x78] sm:$0xff] }
 0x36e   : > { %v2001_v23 = vpop.eup %2000  ;;  %2020 = vrcp.f32 %v1444_v37 }
 0x36f   : > { %v2003_v20 = vpop.eup %2002  ;;  %1509 = vperm.xlu1 %1999, %v2001_v23   ;;  %2022 = vrcp.f32 %v1443_v7 }
 0x370   : > { %v2005_v3 = vpop.eup %2004  ;;  %1499 = vperm.xlu0 %1998, %v2003_v20   ;;  %2024 = vrcp.f32 %v1446_v18 }
 0x371   : > { %v2007_v15 = vpop.eup %2006  ;;  %2026 = vrcp.f32 %v1445_v32 }
 0x372   : > { %v2009_v63 = vpop.eup %2008  ;;  %2028 = vrcp.f32 %v1448_v58 }
 0x373   : > { %1514 = vperm.xlu1 %1999, %v2005_v3   ;;  %v2011_v2 = vpop.eup %2010  ;;  %2030 = vrcp.f32 %v1447_v26  ;;  %v1495_v3 = vld [vmem:[#allocation4 + $0x70] sm:$0xff] }
 0x374   : > { %1504 = vperm.xlu0 %1998, %v2007_v15   ;;  %v2013_v14 = vpop.eup %2012 }
 0x375   : > { %v2015_v22 = vpop.eup %2014 }
 0x376   : > { %v2017_v59 = vpop.eup %2016 }
 0x377   : > { %1524 = vperm.xlu1 %1999, %v2009_v63   ;;  %v2019_v27 = vpop.eup %2018 }
 0x378   : > { %1519 = vperm.xlu0 %1998, %v2011_v2   ;;  %v2021_v31 = vpop.eup %2020 }
 0x379   : > { %v2023_v29 = vpop.eup %2022 }
 0x37a   : > { %v2025_v38 = vpop.eup %2024 }
 0x37b   : > { %1534 = vperm.xlu1 %1999, %v2013_v14   ;;  %v2027_v8 = vpop.eup %2026 }
 0x37c   : > { %1529 = vperm.xlu0 %1998, %v2015_v22   ;;  %v2029_v34 = vpop.eup %2028 }
 0x37d   : > { %v2031_v40 = vpop.eup %2030 }
 0x37f   : > { %1544 = vperm.xlu1 %1999, %v2017_v59  }
 0x380   : > { %1539 = vperm.xlu0 %1998, %v2019_v27  }
 0x383   : > { %1554 = vperm.xlu1 %1999, %v2021_v31  }
 0x384   : > { %1549 = vperm.xlu0 %1998, %v2023_v29  }
 0x387   : > { %1564 = vperm.xlu1 %1999, %v2025_v38  }
 0x388   : > { %1559 = vperm.xlu0 %1998, %v2027_v8  }
 0x38b   : > { %1574 = vperm.xlu1 %1999, %v2029_v34  }
 0x38c   : > { %1569 = vperm.xlu0 %1998, %v2031_v40  }
 0x3ee   : > { %v1510_v24 = vpop.permute.xlu1 %1509 }
 0x3ef   : > { %v1579_v56 = vmul.f32 %v1510_v24, %v1483_v62  ;;  %v1500_v36 = vpop.permute.xlu0 %1499 }
 0x3f0   : > { %v1577_v52 = vmul.f32 %v1500_v36, %v1481_v55 }
 0x3f1   : > { %1596 = vst.msk [vmem:[%s2202_s13 + $0x10] sm:$0xff] %vm453_vm1, %v1579_v56 }
 0x3f2   : > { %1594 = vst.msk [vmem:[%s2202_s13] sm:$0xff] %vm453_vm1, %v1577_v52  ;;  %v1515_v43 = vpop.permute.xlu1 %1514 }
 0x3f3   : > { %v1580_v60 = vmul.f32 %v1515_v43, %v1484_v57  ;;  %v1505_v9 = vpop.permute.xlu0 %1504 }
 0x3f4   : > { %v1578_v61 = vmul.f32 %v1505_v9, %v1482_v10 }
 0x3f5   : > { %1597 = vst.msk [vmem:[%s2202_s13 + $0x18] sm:$0xff] %vm453_vm1, %v1580_v60 }
 0x3f6   : > { %1595 = vst.msk [vmem:[%s2202_s13 + $0x8] sm:$0xff] %vm453_vm1, %v1578_v61  ;;  %v1525_v46 = vpop.permute.xlu1 %1524 }
 0x3f7   : > { %v1582_v41 = vmul.f32 %v1525_v46, %v1486_v39  ;;  %v1520_v5 = vpop.permute.xlu0 %1519 }
 0x3f8   : > { %v1581_v19 = vmul.f32 %v1520_v5, %v1485_v4 }
 0x3f9   : > { %1599 = vst.msk [vmem:[%s2202_s13 + $0x28] sm:$0xff] %vm453_vm1, %v1582_v41 }
 0x3fa   : > { %1598 = vst.msk [vmem:[%s2202_s13 + $0x20] sm:$0xff] %vm453_vm1, %v1581_v19  ;;  %v1535_v44 = vpop.permute.xlu1 %1534 }
 0x3fb   : > { %v1584_v11 = vmul.f32 %v1535_v44, %v1488_v48  ;;  %v1530_v16 = vpop.permute.xlu0 %1529 }
 0x3fc   : > { %v1583_v54 = vmul.f32 %v1530_v16, %v1487_v47 }
 0x3fd   : > { %1601 = vst.msk [vmem:[%s2202_s13 + $0x38] sm:$0xff] %vm453_vm1, %v1584_v11 }
 0x3fe   : > { %1600 = vst.msk [vmem:[%s2202_s13 + $0x30] sm:$0xff] %vm453_vm1, %v1583_v54  ;;  %v1545_v28 = vpop.permute.xlu1 %1544 }
 0x3ff   : > { %v1586_v0 = vmul.f32 %v1545_v28, %v1490_v33  ;;  %v1540_v49 = vpop.permute.xlu0 %1539 }
 0x400   : > { %v1585_v12 = vmul.f32 %v1540_v49, %v1489_v17 }
 0x401   : > { %1603 = vst.msk [vmem:[%s2202_s13 + $0x48] sm:$0xff] %vm453_vm1, %v1586_v0 }
 0x402   : > { %1602 = vst.msk [vmem:[%s2202_s13 + $0x40] sm:$0xff] %vm453_vm1, %v1585_v12  ;;  %v1555_v42 = vpop.permute.xlu1 %1554 }
 0x403   : > { %v1588_v51 = vmul.f32 %v1555_v42, %v1492_v13  ;;  %v1550_v1 = vpop.permute.xlu0 %1549 }
 0x404   : > { %v1587_v6 = vmul.f32 %v1550_v1, %v1491_v50 }
 0x405   : > { %1605 = vst.msk [vmem:[%s2202_s13 + $0x58] sm:$0xff] %vm453_vm1, %v1588_v51 }
 0x406   : > { %1604 = vst.msk [vmem:[%s2202_s13 + $0x50] sm:$0xff] %vm453_vm1, %v1587_v6  ;;  %v1565_v21 = vpop.permute.xlu1 %1564 }
 0x407   : > { %v1590_v45 = vmul.f32 %v1565_v21, %v1494_v25  ;;  %v1560_v23 = vpop.permute.xlu0 %1559 }
 0x408   : > { %v1589_v20 = vmul.f32 %v1560_v23, %v1493_v53 }
 0x409   : > { %1607 = vst.msk [vmem:[%s2202_s13 + $0x68] sm:$0xff] %vm453_vm1, %v1590_v45 }
 0x40a   : > { %1606 = vst.msk [vmem:[%s2202_s13 + $0x60] sm:$0xff] %vm453_vm1, %v1589_v20  ;;  %v1575_v30 = vpop.permute.xlu1 %1574 }
 0x40b   : > { %v1592_v15 = vmul.f32 %v1575_v30, %v1496_v35  ;;  %v1570_v37 = vpop.permute.xlu0 %1569 }
 0x40c   : > { %v1591_v63 = vmul.f32 %v1570_v37, %v1495_v3 }
 0x40d   : > { %1609 = vst.msk [vmem:[%s2202_s13 + $0x78] sm:$0xff] %vm453_vm1, %v1592_v15 }
 0x40e   : > { %1608 = vst.msk [vmem:[%s2202_s13 + $0x70] sm:$0xff] %vm453_vm1, %v1591_v63 }
 0x40f PF: > { %s21_s25 = sadd.s32 1, %s2068_s25   ;;  %s2750_s23 = smov %s2064_s24 }
 0x410   : > { %p18_p1 = scmp.ge.s32.totalorder %s21_s25, 4   ;;  %s2751_s24 = smov %s2753_s0 }
 0x412   :  { %20 = sbr.rel (!%p18_p1) target bundleno = 17 (0x11), region = 87 }

</bundles_post_ra>
